<compile_context>
chip_gen: v7x
topology: tpu7x:2x2x1
jax: 0.10.0
libtpu: 0.0.40
codegen_flags: <defaults>
</compile_context>

<pallas_src>
import functools

import jax
import jax.numpy as jnp
from jax.experimental import pallas as pl
from jax.experimental.pallas import tpu as pltpu


# ----------------------------------------------------------------------------
# Parameter packing (host side, done once)
# ----------------------------------------------------------------------------

_ROW_ALIGN = 16  # bf16 sublane tile is (16, 128): keep every sub-array 16-row aligned


def _align_rows(n):
    return ((n + _ROW_ALIGN - 1) // _ROW_ALIGN) * _ROW_ALIGN


def _align_lanes(n):
    return ((n + 127) // 128) * 128


def _vae_offsets(x_sz, z_sz, hidden):
    """Static row offsets of each sub-array inside the two packed blobs."""
    o = {}
    r = 0
    o["enc_w1"] = r; r += _align_rows(x_sz)
    o["enc_b1"] = r; r += _ROW_ALIGN
    o["enc_w2"] = r; r += _align_rows(hidden)
    o["enc_b2"] = r; r += _ROW_ALIGN
    o["dec_w1"] = r; r += _align_rows(z_sz)
    o["dec_b1"] = r; r += _ROW_ALIGN
    o["dec_w2"] = r; r += _align_rows(hidden)
    o["dec_b2"] = r; r += _ROW_ALIGN
    o["main_rows"] = r

    h = 0
    o["enc_head_w"] = h; h += _align_rows(hidden)
    o["enc_head_b"] = h; h += _ROW_ALIGN
    o["dec_head_w"] = h; h += _align_rows(hidden)
    o["dec_head_b"] = h; h += _ROW_ALIGN
    o["head_rows"] = h
    # Pad head width to a full 128-lane tile: zero extra VMEM for tiny z/x, and both
    # the MXU head results and the final packed store stay lane-dense / unmasked.
    o["head_width"] = max(128, _align_lanes(2 * z_sz), _align_lanes(2 * x_sz))
    return o


def pack_vae_params(params, x_sz, z_sz, hidden, dtype=jnp.bfloat16):
    """Pack the 16 per-layer arrays into two bf16 blobs (one DMA each)."""
    o = _vae_offsets(x_sz, z_sz, hidden)

    def put(buf, row, arr):
        return buf.at[row:row + arr.shape[0], :arr.shape[1]].set(arr)

    main = jnp.zeros((o["main_rows"], hidden), jnp.float32)
    main = put(main, o["enc_w1"], params["enc_w1"])
    main = put(main, o["enc_b1"], params["enc_b1"])
    main = put(main, o["enc_w2"], params["enc_w2"])
    main = put(main, o["enc_b2"], params["enc_b2"])
    main = put(main, o["dec_w1"], params["dec_w1"])
    main = put(main, o["dec_b1"], params["dec_b1"])
    main = put(main, o["dec_w2"], params["dec_w2"])
    main = put(main, o["dec_b2"], params["dec_b2"])

    hw = o["head_width"]
    heads = jnp.zeros((o["head_rows"], hw), jnp.float32)
    # Fused heads: [mu | logvar] and [x_mu | x_logvar] share one weight / bias each.
    heads = put(heads, o["enc_head_w"],
                jnp.concatenate([params["enc_mu_w"], params["enc_lv_w"]], axis=1))
    heads = put(heads, o["enc_head_b"],
                jnp.concatenate([params["enc_mu_b"], params["enc_lv_b"]], axis=1))
    heads = put(heads, o["dec_head_w"],
                jnp.concatenate([params["dec_mu_w"], params["dec_lv_w"]], axis=1))
    heads = put(heads, o["dec_head_b"],
                jnp.concatenate([params["dec_mu_b"], params["dec_lv_b"]], axis=1))
    return main.astype(dtype), heads.astype(dtype), o


# ----------------------------------------------------------------------------
# Kernel
# ----------------------------------------------------------------------------

def _vae_fused_kernel(xin_ref, main_ref, heads_ref, out_ref,
                      *, x_sz, z_sz, hidden, offs):
    H = hidden
    HW = offs["head_width"]

    xin = xin_ref[...].astype(jnp.float32)        # (bm, x_sz + z_sz) merged input
    x = xin[:, :x_sz]
    noise = xin[:, x_sz:x_sz + z_sz]

    def row(ref, r):                              # (1, width) static-slice row load
        return ref[r:r + 1, :].astype(jnp.float32)

    # --- encoder layer 1 (K = x_sz = 2): VPU broadcast-FMA, MXU stays free ---
    h = row(main_ref, offs["enc_b1"])                               # (1, H)
    for k in range(x_sz):                                           # trace-time unroll
        h = h + x[:, k:k + 1] * row(main_ref, offs["enc_w1"] + k)
    h = jnp.maximum(h, 0.0)                                         # (bm, H)

    # --- encoder layer 2 (H x H): bf16 MXU, f32 accumulation ---
    w2 = main_ref[offs["enc_w2"]:offs["enc_w2"] + H, :]
    h = jnp.dot(h.astype(w2.dtype), w2, preferred_element_type=jnp.float32) \
        + row(main_ref, offs["enc_b2"])
    h = jnp.maximum(h, 0.0)

    # --- fused encoder heads: one (H, 128) lane-dense matmul gives [mu | logvar] ---
    ehw = heads_ref[offs["enc_head_w"]:offs["enc_head_w"] + H, :]
    enc_heads = jnp.dot(h.astype(ehw.dtype), ehw, preferred_element_type=jnp.float32) \
        + row(heads_ref, offs["enc_head_b"])                        # (bm, HW)
    mu = enc_heads[:, :z_sz]
    logvar = enc_heads[:, z_sz:2 * z_sz]

    # --- reparameterization: z = mu + noise * exp(logvar / 2) ---
    z = mu + noise * jnp.exp(logvar * 0.5)                          # (bm, z_sz)

    # --- decoder layer 1 (K = z_sz = 2): VPU broadcast-FMA ---
    d = row(main_ref, offs["dec_b1"])                               # (1, H)
    for k in range(z_sz):
        d = d + z[:, k:k + 1] * row(main_ref, offs["dec_w1"] + k)
    d = jnp.maximum(d, 0.0)                                         # (bm, H)

    # --- decoder layer 2 (H x H): bf16 MXU, f32 accumulation ---
    dw2 = main_ref[offs["dec_w2"]:offs["dec_w2"] + H, :]
    d = jnp.dot(d.astype(dw2.dtype), dw2, preferred_element_type=jnp.float32) \
        + row(main_ref, offs["dec_b2"])
    d = jnp.maximum(d, 0.0)

    # --- fused decoder heads: one (H, 128) lane-dense matmul gives [x_mu | x_logvar] ---
    dhw = heads_ref[offs["dec_head_w"]:offs["dec_head_w"] + H, :]
    dec_heads = jnp.dot(d.astype(dhw.dtype), dhw, preferred_element_type=jnp.float32) \
        + row(heads_ref, offs["dec_head_b"])                        # (bm, HW)

    # --- single lane-dense packed store: [enc_heads (128) | dec_heads (128)] ---
    out_ref[:, :HW] = enc_heads
    out_ref[:, HW:] = dec_heads


# ----------------------------------------------------------------------------
# Wrapper
# ----------------------------------------------------------------------------

def _choose_bm(batch, block_batch):
    """Batch-block rows: multiple of 8, <= block_batch, and (when possible) at
    least two blocks so the 'parallel' grid axis can feed both v7x TensorCores.
    On single-core chips (v5e/v6e) the second block only costs one extra
    ~0.35us pipeline step, which is negligible."""
    bm = min(block_batch, max(batch, 8))
    if batch >= 16:
        half = ((batch + 1) // 2 + 7) // 8 * 8
        bm = min(bm, half)
    return max(8, (bm + 7) // 8 * 8)


def _weight_spec(shape):
    """Grid-invariant weight blob: full-array block, constant index map.
    Single-buffered so the (potentially large) blob is not double-buffered in
    VMEM — matters most on v7x's 64 MiB VMEM as hidden grows."""
    try:
        return pl.BlockSpec(shape, lambda i: (0, 0),
                            pipeline_mode=pl.Buffered(buffer_count=1))
    except (TypeError, AttributeError):  # older jax without pipeline_mode
        return pl.BlockSpec(shape, lambda i: (0, 0))


def vae_forward_pallas(x, noise, packed_main, packed_heads, offs, *,
                       x_sz, z_sz, hidden, block_batch=512):
    """Full VAE forward pass in one Pallas kernel.

    x: (B, x_sz) f32, noise: (B, z_sz) f32 (reparameterization noise).
    Returns (mu, logvar, x_mu, x_logvar), each f32.
    """
    B = x.shape[0]
    in_w = x_sz + z_sz
    hw = offs["head_width"]
    out_w = 2 * hw

    bm = _choose_bm(B, block_batch)
    grid_b = pl.cdiv(B, bm)
    B_pad = grid_b * bm

    # One merged input (single DMA per grid step); pad the batch so every block is full.
    xin = jnp.concatenate([x.astype(jnp.float32), noise.astype(jnp.float32)], axis=1)
    if B_pad != B:
        xin = jnp.pad(xin, ((0, B_pad - B), (0, 0)))

    weight_bytes = (packed_main.size * packed_main.dtype.itemsize
                    + packed_heads.size * packed_heads.dtype.itemsize)
    act_bytes = 2 * 2 * bm * (in_w + out_w) * 4       # double-buffered in/out blocks
    act_bytes += 8 * bm * hidden * 4                  # live activations + headroom
    vmem_limit = int(min(max(2 * weight_bytes + act_bytes + (4 << 20), 16 << 20),
                         64 << 20))

    flops = 2 * B_pad * (x_sz * hidden + hidden * hidden + hidden * 2 * z_sz
                         + z_sz * hidden + hidden * hidden + hidden * 2 * x_sz)
    cost = pl.CostEstimate(
        flops=flops,
        transcendentals=B_pad * z_sz,
        bytes_accessed=int(xin.size * 4 + weight_bytes + B_pad * out_w * 4))

    kernel = functools.partial(_vae_fused_kernel, x_sz=x_sz, z_sz=z_sz,
                               hidden=hidden, offs=offs)

    packed_out = pl.pallas_call(
        kernel,
        out_shape=jax.ShapeDtypeStruct((B_pad, out_w), jnp.float32),
        grid=(grid_b,),
        in_specs=[
            pl.BlockSpec((bm, in_w), lambda i: (i, 0)),   # merged [x | noise]
            _weight_spec(packed_main.shape),              # resident weights
            _weight_spec(packed_heads.shape),             # resident head weights
        ],
        out_specs=pl.BlockSpec((bm, out_w), lambda i: (i, 0)),
        compiler_params=pltpu.CompilerParams(
            dimension_semantics=("parallel",),            # megacore-friendly on v7x
            vmem_limit_bytes=vmem_limit),
        cost_estimate=cost,
    )(xin, packed_main, packed_heads)

    mu = packed_out[:B, :z_sz]
    logvar = packed_out[:B, z_sz:2 * z_sz]
    x_mu = packed_out[:B, hw:hw + x_sz]
    x_logvar = packed_out[:B, hw + x_sz:hw + 2 * x_sz]
    return mu, logvar, x_mu, x_logvar


# ----------------------------------------------------------------------------
# Init + pure-JAX reference
# ----------------------------------------------------------------------------

def init_linear(key, fan_in, fan_out):
    """PyTorch-style Linear init; weight returned as (in, out), bias as (1, out)."""
    kw, kb = jax.random.split(key)
    bound = 1.0 / (fan_in ** 0.5)
    w = jax.random.uniform(kw, (fan_in, fan_out), jnp.float32, -bound, bound)
    b = jax.random.uniform(kb, (1, fan_out), jnp.float32, -bound, bound)
    return w, b


def init_vae_params(key, x_sz, z_sz, hidden_sz):
    keys = jax.random.split(key, 8)
    p = {}
    p["enc_w1"], p["enc_b1"] = init_linear(keys[0], x_sz, hidden_sz)
    p["enc_w2"], p["enc_b2"] = init_linear(keys[1], hidden_sz, hidden_sz)
    p["enc_mu_w"], p["enc_mu_b"] = init_linear(keys[2], hidden_sz, z_sz)
    p["enc_lv_w"], p["enc_lv_b"] = init_linear(keys[3], hidden_sz, z_sz)
    p["dec_w1"], p["dec_b1"] = init_linear(keys[4], z_sz, hidden_sz)
    p["dec_w2"], p["dec_b2"] = init_linear(keys[5], hidden_sz, hidden_sz)
    p["dec_mu_w"], p["dec_mu_b"] = init_linear(keys[6], hidden_sz, x_sz)
    p["dec_lv_w"], p["dec_lv_b"] = init_linear(keys[7], hidden_sz, x_sz)
    return p


def vae_forward_ref(x, noise, p):
    """Pure-JAX f32 reference for correctness checking."""
    dot = lambda a, b: jnp.dot(a, b, precision=jax.lax.Precision.HIGHEST)
    h = jax.nn.relu(dot(x, p["enc_w1"]) + p["enc_b1"])
    h = jax.nn.relu(dot(h, p["enc_w2"]) + p["enc_b2"])
    mu = dot(h, p["enc_mu_w"]) + p["enc_mu_b"]
    logvar = dot(h, p["enc_lv_w"]) + p["enc_lv_b"]
    z = mu + noise * jnp.exp(logvar / 2)
    d = jax.nn.relu(dot(z, p["dec_w1"]) + p["dec_b1"])
    d = jax.nn.relu(dot(d, p["dec_w2"]) + p["dec_b2"])
    x_mu = dot(d, p["dec_mu_w"]) + p["dec_mu_b"]
    x_logvar = dot(d, p["dec_lv_w"]) + p["dec_lv_b"]
    return mu, logvar, x_mu, x_logvar


if __name__ == "__main__":
    # Small shapes consistent with the module: x_sz = z_sz = 2.
    # hidden = 256 (multiple of 256 -> full MXU width on v6e/v7x, 2x128 on v5e).
    B, X_SZ, Z_SZ, HIDDEN = 128, 2, 2, 256

    key = jax.random.PRNGKey(0)
    k_params, k_x, k_noise = jax.random.split(key, 3)

    params = init_vae_params(k_params, X_SZ, Z_SZ, HIDDEN)
    main_blob, heads_blob, offs = pack_vae_params(params, X_SZ, Z_SZ, HIDDEN)

    x = jax.random.normal(k_x, (B, X_SZ), jnp.float32)
    # Noise for the reparameterization trick (torch.randn equivalent), passed in
    # explicitly so the kernel is deterministic.
    noise = jax.random.normal(k_noise, (B, Z_SZ), jnp.float32)

    fwd = jax.jit(functools.partial(
        vae_forward_pallas, offs=offs, x_sz=X_SZ, z_sz=Z_SZ, hidden=HIDDEN))

    outs = jax.block_until_ready(fwd(x, noise, main_blob, heads_blob))
    mu, logvar, x_mu, x_logvar = outs

    # Verify against the pure-JAX f32 reference (bf16 weights -> relaxed tolerance).
    ref = vae_forward_ref(x, noise, params)
    for got, want in zip(outs, ref):
        assert got.shape == want.shape and got.dtype == want.dtype
        assert jnp.allclose(got, want, atol=3e-2, rtol=3e-2), "mismatch vs reference"

    print("KERNEL_OK")
</pallas_src>

<mosaic_0001>
module attributes {stable_mosaic.version = 11 : i64} {
  func.func @_vae_fused_kernel(%arg0: i32, %arg1: memref<64x4xf32, #tpu.memory_space<vmem>>, %arg2: memref<608x256xbf16, #tpu.memory_space<vmem>>, %arg3: memref<544x128xbf16, #tpu.memory_space<vmem>>, %arg4: memref<64x256xf32, #tpu.memory_space<vmem>>) attributes {dimension_semantics = [#tpu.dimension_semantics<parallel>], iteration_bounds = array<i64: 2>, scalar_prefetch = 0 : i64, scratch_operands = 0 : i64, tpu.core_type = #tpu.core_type<tc>, window_params = [{transform_indices = @transform_0, window_bounds = array<i64: 64, 4>}, {pipeline_mode = #tpu.pipeline_mode<synchronous>, transform_indices = @transform_1, window_bounds = array<i64: 608, 256>}, {pipeline_mode = #tpu.pipeline_mode<synchronous>, transform_indices = @transform_2, window_bounds = array<i64: 544, 128>}, {transform_indices = @transform_3, window_bounds = array<i64: 64, 256>}]} {
    %c0 = arith.constant 0 : index
    %c0_0 = arith.constant 0 : index
    %0 = vector.load %arg1[%c0, %c0_0] : memref<64x4xf32, #tpu.memory_space<vmem>>, vector<64x4xf32>
    %1 = vector.extract_strided_slice %0 {offsets = [0, 0], sizes = [64, 2], strides = [1, 1]} : vector<64x4xf32> to vector<64x2xf32>
    %2 = vector.extract_strided_slice %0 {offsets = [0, 2], sizes = [64, 2], strides = [1, 1]} : vector<64x4xf32> to vector<64x2xf32>
    %c16 = arith.constant 16 : index
    %c0_1 = arith.constant 0 : index
    %3 = vector.load %arg2[%c16, %c0_1] : memref<608x256xbf16, #tpu.memory_space<vmem>>, vector<1x256xbf16>
    %4 = arith.extf %3 : vector<1x256xbf16> to vector<1x256xf32>
    %5 = vector.extract_strided_slice %1 {offsets = [0, 0], sizes = [64, 1], strides = [1, 1]} : vector<64x2xf32> to vector<64x1xf32>
    %c0_2 = arith.constant 0 : index
    %c0_3 = arith.constant 0 : index
    %6 = vector.load %arg2[%c0_2, %c0_3] : memref<608x256xbf16, #tpu.memory_space<vmem>>, vector<1x256xbf16>
    %7 = arith.extf %6 : vector<1x256xbf16> to vector<1x256xf32>
    %8 = vector.broadcast %5 : vector<64x1xf32> to vector<64x256xf32>
    %9 = vector.broadcast %7 : vector<1x256xf32> to vector<64x256xf32>
    %10 = arith.mulf %8, %9 : vector<64x256xf32>
    %11 = vector.broadcast %4 : vector<1x256xf32> to vector<64x256xf32>
    %12 = arith.addf %11, %10 : vector<64x256xf32>
    %13 = vector.extract_strided_slice %1 {offsets = [0, 1], sizes = [64, 1], strides = [1, 1]} : vector<64x2xf32> to vector<64x1xf32>
    %c1 = arith.constant 1 : index
    %c0_4 = arith.constant 0 : index
    %14 = vector.load %arg2[%c1, %c0_4] : memref<608x256xbf16, #tpu.memory_space<vmem>>, vector<1x256xbf16>
    %15 = arith.extf %14 : vector<1x256xbf16> to vector<1x256xf32>
    %16 = vector.broadcast %13 : vector<64x1xf32> to vector<64x256xf32>
    %17 = vector.broadcast %15 : vector<1x256xf32> to vector<64x256xf32>
    %18 = arith.mulf %16, %17 : vector<64x256xf32>
    %19 = arith.addf %12, %18 : vector<64x256xf32>
    %cst = arith.constant 0.000000e+00 : f32
    %20 = vector.broadcast %cst : f32 to vector<64x256xf32>
    %21 = arith.maximumf %19, %20 : vector<64x256xf32>
    %c32 = arith.constant 32 : index
    %c0_5 = arith.constant 0 : index
    %22 = vector.load %arg2[%c32, %c0_5] : memref<608x256xbf16, #tpu.memory_space<vmem>>, vector<256x256xbf16>
    %23 = arith.truncf %21 : vector<64x256xf32> to vector<64x256xbf16>
    %cst_6 = arith.constant dense<0.000000e+00> : vector<64x256xf32>
    %24 = tpu.matmul %23, %22, %cst_6 {dimension_numbers = #tpu.dot_dimension_numbers<[1], [0], [0], [1], [0, 0, 1, 1], [], []>} : vector<64x256xbf16>, vector<256x256xbf16>, vector<64x256xf32> -> vector<64x256xf32>
    %c288 = arith.constant 288 : index
    %c0_7 = arith.constant 0 : index
    %25 = vector.load %arg2[%c288, %c0_7] : memref<608x256xbf16, #tpu.memory_space<vmem>>, vector<1x256xbf16>
    %26 = arith.extf %25 : vector<1x256xbf16> to vector<1x256xf32>
    %27 = vector.broadcast %26 : vector<1x256xf32> to vector<64x256xf32>
    %28 = arith.addf %24, %27 : vector<64x256xf32>
    %cst_8 = arith.constant 0.000000e+00 : f32
    %29 = vector.broadcast %cst_8 : f32 to vector<64x256xf32>
    %30 = arith.maximumf %28, %29 : vector<64x256xf32>
    %c0_9 = arith.constant 0 : index
    %c0_10 = arith.constant 0 : index
    %31 = vector.load %arg3[%c0_9, %c0_10] : memref<544x128xbf16, #tpu.memory_space<vmem>>, vector<256x128xbf16>
    %32 = arith.truncf %30 : vector<64x256xf32> to vector<64x256xbf16>
    %cst_11 = arith.constant dense<0.000000e+00> : vector<64x128xf32>
    %33 = tpu.matmul %32, %31, %cst_11 {dimension_numbers = #tpu.dot_dimension_numbers<[1], [0], [0], [1], [0, 0, 1, 1], [], []>} : vector<64x256xbf16>, vector<256x128xbf16>, vector<64x128xf32> -> vector<64x128xf32>
    %c256 = arith.constant 256 : index
    %c0_12 = arith.constant 0 : index
    %34 = vector.load %arg3[%c256, %c0_12] : memref<544x128xbf16, #tpu.memory_space<vmem>>, vector<1x128xbf16>
    %35 = arith.extf %34 : vector<1x128xbf16> to vector<1x128xf32>
    %36 = vector.broadcast %35 : vector<1x128xf32> to vector<64x128xf32>
    %37 = arith.addf %33, %36 : vector<64x128xf32>
    %38 = vector.extract_strided_slice %37 {offsets = [0, 0], sizes = [64, 2], strides = [1, 1]} : vector<64x128xf32> to vector<64x2xf32>
    %39 = vector.extract_strided_slice %37 {offsets = [0, 2], sizes = [64, 2], strides = [1, 1]} : vector<64x128xf32> to vector<64x2xf32>
    %cst_13 = arith.constant 5.000000e-01 : f32
    %40 = vector.broadcast %cst_13 : f32 to vector<64x2xf32>
    %41 = arith.mulf %39, %40 : vector<64x2xf32>
    %42 = math.exp %41 : vector<64x2xf32>
    %43 = arith.mulf %2, %42 : vector<64x2xf32>
    %44 = arith.addf %38, %43 : vector<64x2xf32>
    %c320 = arith.constant 320 : index
    %c0_14 = arith.constant 0 : index
    %45 = vector.load %arg2[%c320, %c0_14] : memref<608x256xbf16, #tpu.memory_space<vmem>>, vector<1x256xbf16>
    %46 = arith.extf %45 : vector<1x256xbf16> to vector<1x256xf32>
    %47 = vector.extract_strided_slice %44 {offsets = [0, 0], sizes = [64, 1], strides = [1, 1]} : vector<64x2xf32> to vector<64x1xf32>
    %c304 = arith.constant 304 : index
    %c0_15 = arith.constant 0 : index
    %48 = vector.load %arg2[%c304, %c0_15] : memref<608x256xbf16, #tpu.memory_space<vmem>>, vector<1x256xbf16>
    %49 = arith.extf %48 : vector<1x256xbf16> to vector<1x256xf32>
    %50 = vector.broadcast %47 : vector<64x1xf32> to vector<64x256xf32>
    %51 = vector.broadcast %49 : vector<1x256xf32> to vector<64x256xf32>
    %52 = arith.mulf %50, %51 : vector<64x256xf32>
    %53 = vector.broadcast %46 : vector<1x256xf32> to vector<64x256xf32>
    %54 = arith.addf %53, %52 : vector<64x256xf32>
    %55 = vector.extract_strided_slice %44 {offsets = [0, 1], sizes = [64, 1], strides = [1, 1]} : vector<64x2xf32> to vector<64x1xf32>
    %c305 = arith.constant 305 : index
    %c0_16 = arith.constant 0 : index
    %56 = vector.load %arg2[%c305, %c0_16] : memref<608x256xbf16, #tpu.memory_space<vmem>>, vector<1x256xbf16>
    %57 = arith.extf %56 : vector<1x256xbf16> to vector<1x256xf32>
    %58 = vector.broadcast %55 : vector<64x1xf32> to vector<64x256xf32>
    %59 = vector.broadcast %57 : vector<1x256xf32> to vector<64x256xf32>
    %60 = arith.mulf %58, %59 : vector<64x256xf32>
    %61 = arith.addf %54, %60 : vector<64x256xf32>
    %cst_17 = arith.constant 0.000000e+00 : f32
    %62 = vector.broadcast %cst_17 : f32 to vector<64x256xf32>
    %63 = arith.maximumf %61, %62 : vector<64x256xf32>
    %c336 = arith.constant 336 : index
    %c0_18 = arith.constant 0 : index
    %64 = vector.load %arg2[%c336, %c0_18] : memref<608x256xbf16, #tpu.memory_space<vmem>>, vector<256x256xbf16>
    %65 = arith.truncf %63 : vector<64x256xf32> to vector<64x256xbf16>
    %cst_19 = arith.constant dense<0.000000e+00> : vector<64x256xf32>
    %66 = tpu.matmul %65, %64, %cst_19 {dimension_numbers = #tpu.dot_dimension_numbers<[1], [0], [0], [1], [0, 0, 1, 1], [], []>} : vector<64x256xbf16>, vector<256x256xbf16>, vector<64x256xf32> -> vector<64x256xf32>
    %c592 = arith.constant 592 : index
    %c0_20 = arith.constant 0 : index
    %67 = vector.load %arg2[%c592, %c0_20] : memref<608x256xbf16, #tpu.memory_space<vmem>>, vector<1x256xbf16>
    %68 = arith.extf %67 : vector<1x256xbf16> to vector<1x256xf32>
    %69 = vector.broadcast %68 : vector<1x256xf32> to vector<64x256xf32>
    %70 = arith.addf %66, %69 : vector<64x256xf32>
    %cst_21 = arith.constant 0.000000e+00 : f32
    %71 = vector.broadcast %cst_21 : f32 to vector<64x256xf32>
    %72 = arith.maximumf %70, %71 : vector<64x256xf32>
    %c272 = arith.constant 272 : index
    %c0_22 = arith.constant 0 : index
    %73 = vector.load %arg3[%c272, %c0_22] : memref<544x128xbf16, #tpu.memory_space<vmem>>, vector<256x128xbf16>
    %74 = arith.truncf %72 : vector<64x256xf32> to vector<64x256xbf16>
    %cst_23 = arith.constant dense<0.000000e+00> : vector<64x128xf32>
    %75 = tpu.matmul %74, %73, %cst_23 {dimension_numbers = #tpu.dot_dimension_numbers<[1], [0], [0], [1], [0, 0, 1, 1], [], []>} : vector<64x256xbf16>, vector<256x128xbf16>, vector<64x128xf32> -> vector<64x128xf32>
    %c528 = arith.constant 528 : index
    %c0_24 = arith.constant 0 : index
    %76 = vector.load %arg3[%c528, %c0_24] : memref<544x128xbf16, #tpu.memory_space<vmem>>, vector<1x128xbf16>
    %77 = arith.extf %76 : vector<1x128xbf16> to vector<1x128xf32>
    %78 = vector.broadcast %77 : vector<1x128xf32> to vector<64x128xf32>
    %79 = arith.addf %75, %78 : vector<64x128xf32>
    %c0_25 = arith.constant 0 : index
    %c0_26 = arith.constant 0 : index
    %80 = vector.load %arg4[%c0_25, %c0_26] : memref<64x256xf32, #tpu.memory_space<vmem>>, vector<64x128xf32>
    tpu.vector_store %arg4[%c0_25, %c0_26], %37 {strides = array<i32>} : memref<64x256xf32, #tpu.memory_space<vmem>>, vector<64x128xf32>,
    %c0_27 = arith.constant 0 : index
    %c128 = arith.constant 128 : index
    %81 = vector.load %arg4[%c0_27, %c128] : memref<64x256xf32, #tpu.memory_space<vmem>>, vector<64x128xf32>
    tpu.vector_store %arg4[%c0_27, %c128], %79 {strides = array<i32>} : memref<64x256xf32, #tpu.memory_space<vmem>>, vector<64x128xf32>,
    return
  }
  func.func @transform_0(%arg0: i32) -> (i32, i32) {
    %c0_i32 = arith.constant 0 : i32
    %c0_i32_0 = arith.constant 0 : i32
    return %arg0, %c0_i32 : i32, i32
  }
  func.func @transform_1(%arg0: i32) -> (i32, i32) {
    %c0_i32 = arith.constant 0 : i32
    %c0_i32_0 = arith.constant 0 : i32
    %c0_i32_1 = arith.constant 0 : i32
    return %c0_i32, %c0_i32_0 : i32, i32
  }
  func.func @transform_2(%arg0: i32) -> (i32, i32) {
    %c0_i32 = arith.constant 0 : i32
    %c0_i32_0 = arith.constant 0 : i32
    %c0_i32_1 = arith.constant 0 : i32
    return %c0_i32, %c0_i32_0 : i32, i32
  }
  func.func @transform_3(%arg0: i32) -> (i32, i32) {
    %c0_i32 = arith.constant 0 : i32
    %c0_i32_0 = arith.constant 0 : i32
    return %arg0, %c0_i32 : i32, i32
  }
}

</mosaic_0001>

<bundles_post_ra>
// kernel: vae_forward_pallas.1
= control target key start
LH: loop header
LB: loop body
LE: loop exit
PB: predicated region body
PF: predicated region fallthrough
CT: control target
= control target key end

     0   :  { %8 = vsyncpa [#allocation3], 0  ;;  %s2649_s0 = inlined_call_operand.vmem [shape: f32[128,4], index: 0, kind: input, shape index: {}]   ;;  %s2650_s1 = inlined_call_operand.hbm [shape: bf16[608,256], index: 1, kind: input, shape index: {}]   ;;  %s2651_s2 = inlined_call_operand.hbm [shape: bf16[544,128], index: 2, kind: input, shape index: {}]   ;;  %s2652_s3 = inlined_call_operand.vmem [shape: f32[128,256], index: 3, kind: output, shape index: {}]  }
   0x1   :  { %9 = vsyncpa [#allocation5], 0  ;;  %s2258_s12 = smov 0  }
   0x2 LB: > { %s2229_s13 = smov [#allocation2]   ;;  %s1761_s15 = sadd.s32 4294967295, %s2227_s12   ;;  %s2227_s12 = sphi %s2258_s12, %s15_s12  }
   0x3   : > { %s126_s14 = sshll.u32 %s2229_s13, 4  ;;  %p1763_p0 = scmp.ge.s32.totalorder %s2227_s12, 1  ;;  %s127_s14 = int_to_ptr.vmem [resolvable:$true] %s126_s14 }
   0x4   : > { %p114_p1 = scmp.lt.s32.totalorder %s2227_s12, 3  ;;  %p2272_p3 = scmp.eq.s32.totalorder %s1761_s15, 0 }
   0x5   : > { %s2230_s18 = smov [#allocation4]   ;;  %s2157_s23 = scalar_lea.hbm %s2650_s1, 9728 }
   0x6   : > { %p2266_p2 = pnand %p1763_p0, %p114_p1  ;;  %s139_s19 = sshll.u32 %s2230_s18, 4  ;;  %s2284_s19 = int_to_ptr.vmem [resolvable:$true] %s139_s19 }
   0x7   : > { %s2657_s17 = scalar_select %p2272_p3, 1, 0 }
   0x8   : > { %s2656_s16 = scalar_select %p2266_p2, 1, 0 }
   0x9   : > { %p1962_p4 = pneg %p2266_p2  ;;  %p2158_p6 = scmp.ne.s32.totalorder %s2650_s1, %s2157_s23 }
   0xa   : > { %p2164_p10 = scmp.lt.u32.totalorder %s2157_s23, %s2650_s1 }
   0xb   : > { %p2280_p5 = pnand %p2272_p3, %p1962_p4 }
   0xd   : > { %p2159_p7 = pneg %p2280_p5 }
   0xf   : > { %p2160_p8 = pnand %p2159_p7, %p2158_p6 }
  0x11   : > { %p2161_p9 = pneg %p2160_p8 }
  0x13   : > { %p2166_p11 = pnand %p2164_p10, %p2161_p9 }
  0x15   : > { %2169 = shalt.err (!%p2166_p11)
}
  0x16   : > { %s2170_s28 = scalar_lea.vmem %s127_s14, 9728  ;;  %p2178_p1 = scmp.lt.s32.totalorder %s127_s14, %s127_s14 }
  0x17   : > { %p2171_p12 = scmp.ne.s32.totalorder %s127_s14, %s2170_s28  ;;  %p2179_p4 = scmp.lt.s32.totalorder %s2170_s28, %s2170_s28 }
  0x19   : > { %p2173_p13 = pnand %p2171_p12, %p2159_p7  ;;  %p2180_p3 = por %p2179_p4, %p2178_p1 }
  0x1b   : > { %p2174_p0 = pneg %p2173_p13 }
  0x1d   : > { %p2181_p2 = pnand %p2180_p3, %p2174_p0 }
  0x1f   : > { %2184 = shalt.err (!%p2181_p2)
}
  0x20   : > { %s2231_s29 = smov 128   ;;  %s2232_s30 = smov 8  }
  0x21   : > { %1965 = dma.hbm_to_vmem [thread:$0]  (!%p2280_p5), %s2650_s1, 9728, %s127_s14, [#allocation3], %s2231_s29, %s2231_s29, %s2232_s30  }
  0x22   : > { %s2185_s8 = scalar_lea.hbm %s2651_s2, 4352 }
  0x23   : > { %p2186_p6 = scmp.ne.s32.totalorder %s2651_s2, %s2185_s8  ;;  %p2192_p8 = scmp.lt.u32.totalorder %s2185_s8, %s2651_s2 }
  0x25   : > { %p2188_p2 = pnand %p2186_p6, %p2159_p7 }
  0x27   : > { %p2189_p3 = pneg %p2188_p2 }
  0x29   : > { %p2194_p9 = pnand %p2192_p8, %p2189_p3 }
  0x2b   : > { %2197 = shalt.err (!%p2194_p9)
}
  0x2c   : > { %s2198_s14 = scalar_lea.vmem %s2284_s19, 4352  ;;  %p2206_p13 = scmp.lt.s32.totalorder %s2284_s19, %s2284_s19 }
  0x2d   : > { %p2199_p10 = scmp.ne.s32.totalorder %s2284_s19, %s2198_s14  ;;  %p2207_p0 = scmp.lt.s32.totalorder %s2198_s14, %s2198_s14 }
  0x2f   : > { %p2201_p11 = pnand %p2199_p10, %p2159_p7  ;;  %p2208_p1 = por %p2207_p0, %p2206_p13 }
  0x31   : > { %p2202_p12 = pneg %p2201_p11 }
  0x33   : > { %p2209_p4 = pnand %p2208_p1, %p2202_p12 }
  0x35   : > { %2212 = shalt.err (!%p2209_p4)
}
  0x36   : > { %s2233_s18 = smov 64   ;;  %s2234_s21 = smov 4  }
  0x37   : > { %1968 = dma.hbm_to_vmem [thread:$0]  (!%p2280_p5), %s2651_s2, 4352, %s2284_s19, [#allocation5], %s2233_s18, %s2233_s18, %s2234_s21  }
  0x38   : > { %p2659_p6 = scmp.ne.s32.totalorder %s2656_s16, 0 }
  0x39   : > { %p2660_p7 = scmp.ne.s32.totalorder (!%p2659_p6), %s2657_s17, 0 }
  0x3a   : > { %164 = sbr.rel (%p2659_p6) target bundleno = 1413 (0x585), region = 32 }
  0x41   : > { %2218 = dma.done.wait (%p2660_p7), [#allocation3], 9728  }
  0x42   : > { %2220 = vsyncadd (%p2660_p7), [#allocation3], 4294957568 }
  0x43   : > { %2222 = dma.done.wait (%p2660_p7), [#allocation5], 4352  }
  0x44   : > { %2224 = vsyncadd (%p2660_p7), [#allocation5], 4294962944  ;;  %s1770_s20 = sshll.u32 %s1761_s15, 3  ;;  %v2235_v0 = vmov 1   ;;  %v2236_v1 = vmov 0   ;;  %v2061_v34 = vld [vmem:[#allocation4 + $0x40] sm:$0xff]   ;;  %v261_v53 = vlaneseq }
  0x45   : > { %1991 = vset.pattern.permute.xlu1 %v2235_v0  ;;  %1990 = vset.pattern.permute.xlu0 %v2236_v1  ;;  %p194_p5 = scmp.lt.s32.totalorder %s1770_s20, 15  ;;  %v2013_v4 = vld [vmem:[#allocation2 + $0x24] ss:$8 sps:$4 sm:$0xff]   ;;  %v2015_v5 = vld [vmem:[#allocation2 + $0x20] ss:$8 sps:$4 sm:$0xff]   ;;  %v2065_v41 = vld [vmem:[#allocation4 + $0x50] sm:$0xff]  }
  0x46   : > { %v2016_v6 = vld [vmem:[#allocation2 + $0x34] ss:$8 sps:$4 sm:$0xff]   ;;  %608 = vmatprep.subr.bf16.mxu0 %v2013_v4  ;;  %v2018_v9 = vld [vmem:[#allocation2 + $0x30] ss:$8 sps:$4 sm:$0xff]   ;;  %v2019_v10 = vld [vmem:[#allocation2 + $0x44] ss:$8 sps:$4 sm:$0xff]   ;;  %1874 = vmatprep.subr.bf16.mxu1 %v2061_v34 }
  0x47   : > { %s2662_s20 = smov (!%p194_p5, %s1770_s20), 15  ;;  %609 = vmatpush1.bf16.msra.mxu0 %v2015_v5  ;;  %v2021_v11 = vld [vmem:[#allocation2 + $0x40] ss:$8 sps:$4 sm:$0xff]   ;;  %v2022_v12 = vld [vmem:[#allocation2 + $0x54] ss:$8 sps:$4 sm:$0xff]   ;;  %v262_v54 = vshrl.u32 %v261_v53, 7 }
  0x48   : > { %s1771_s16 = sshll.u32 %s2662_s20, 3  ;;  %610 = vmatprep.subr.bf16.mxu0 %v2016_v6  ;;  %v2024_v15 = vld [vmem:[#allocation2 + $0x50] ss:$8 sps:$4 sm:$0xff]   ;;  %v2025_v16 = vld [vmem:[#allocation2 + $0x64] ss:$8 sps:$4 sm:$0xff]   ;;  %s1873_s15 = sshll.u32 %s2662_s20, 4 }
  0x49   : > { %s2353_s25 = scalar_lea.vmem %s2649_s0, %s1771_s16  ;;  %v2027_v18 = vld [vmem:[#allocation2 + $0x60] ss:$8 sps:$4 sm:$0xff]   ;;  %v2028_v19 = vld [vmem:[#allocation2 + $0x74] ss:$8 sps:$4 sm:$0xff]   ;;  %v2030_v20 = vld [vmem:[#allocation2 + $0x70] ss:$8 sps:$4 sm:$0xff]   ;;  %s2485_s27 = scalar_lea.vmem %s2652_s3, %s1873_s15 }
  0x4a   : > { %v2356_v2 = vld [vmem:[%s2353_s25] sm:$0xff]  ;;  %v2361_v3 = vld [vmem:[%s2353_s25 + $0x8] sm:$0xff]  ;;  %v2366_v7 = vld [vmem:[%s2353_s25 + $0x10] sm:$0xff]  ;;  %v2406_v59 = vsub.s32 0, %v262_v54  ;;  %v2408_v60 = vsub.s32 1, %v262_v54  ;;  %s2237_s28 = smov 126  }
  0x4b   : > { %310 = vperm.xlu1 %1991, %v2356_v2   ;;  %223 = vperm.xlu0 %1990, %v2356_v2   ;;  %v2369_v8 = vld [vmem:[%s2353_s25 + $0x18] sm:$0xff]  ;;  %v2379_v13 = vld [vmem:[%s2353_s25 + $0x20] sm:$0xff]  ;;  %v2382_v14 = vld [vmem:[%s2353_s25 + $0x28] sm:$0xff] }
  0x4c   : > { %611 = vmatpush1.bf16.msra.mxu0 %v2018_v9  ;;  %v2389_v17 = vld [vmem:[%s2353_s25 + $0x30] sm:$0xff]  ;;  %v2031_v21 = vld [vmem:[#allocation2 + $0x84] ss:$8 sps:$4 sm:$0xff]   ;;  %v2033_v22 = vld [vmem:[#allocation2 + $0x80] ss:$8 sps:$4 sm:$0xff]  }
  0x4d   : > { %612 = vmatprep.subr.bf16.mxu0 %v2019_v10  ;;  %v2034_v23 = vld [vmem:[#allocation2 + $0x94] ss:$8 sps:$4 sm:$0xff]   ;;  %v2036_v25 = vld [vmem:[#allocation2 + $0x90] ss:$8 sps:$4 sm:$0xff]   ;;  %v2037_v26 = vld [vmem:[#allocation2 + $0xa4] ss:$8 sps:$4 sm:$0xff]  }
  0x4e   : > { %v2398_v24 = vld [vmem:[%s2353_s25 + $0x38] sm:$0xff]  ;;  %v2039_v27 = vld [vmem:[#allocation2 + $0xa0] ss:$8 sps:$4 sm:$0xff]   ;;  %v2043_v30 = vld [vmem:[#allocation2 + $0xc4] ss:$8 sps:$4 sm:$0xff]  }
  0x4f   : > { %314 = vperm.xlu1 %1991, %v2361_v3   ;;  %228 = vperm.xlu0 %1990, %v2361_v3   ;;  %v2040_v28 = vld [vmem:[#allocation2 + $0xb4] ss:$8 sps:$4 sm:$0xff]   ;;  %v2042_v29 = vld [vmem:[#allocation2 + $0xb0] ss:$8 sps:$4 sm:$0xff]   ;;  %v2045_v31 = vld [vmem:[#allocation2 + $0xc0] ss:$8 sps:$4 sm:$0xff]  }
  0x50   : > { %613 = vmatpush1.bf16.msra.mxu0 %v2021_v11  ;;  %v2046_v32 = vld [vmem:[#allocation2 + $0xd4] ss:$8 sps:$4 sm:$0xff]   ;;  %v2048_v33 = vld [vmem:[#allocation2 + $0xd0] ss:$8 sps:$4 sm:$0xff]   ;;  %v2062_v35 = vld [vmem:[#allocation4] sm:$0xff]  }
  0x51   : > { %614 = vmatprep.subr.bf16.mxu0 %v2022_v12  ;;  %v2063_v36 = vld [vmem:[#allocation4 + $0x48] sm:$0xff]   ;;  %v2052_v39 = vld [vmem:[#allocation2 + $0xf4] ss:$8 sps:$4 sm:$0xff]   ;;  %1875 = vmatpush3.bf16.msra.mxu1 %v2062_v35  ;;  %v2054_v43 = vld [vmem:[#allocation2 + $0xf0] ss:$8 sps:$4 sm:$0xff]  }
  0x52   : > { %v2049_v37 = vld [vmem:[#allocation2 + $0xe4] ss:$8 sps:$4 sm:$0xff]   ;;  %v2051_v38 = vld [vmem:[#allocation2 + $0xe0] ss:$8 sps:$4 sm:$0xff]   ;;  %1876 = vmatprep.subr.bf16.mxu1 %v2063_v36  ;;  %v2066_v42 = vld [vmem:[#allocation4 + $0x10] sm:$0xff]  }
  0x53   : > { %1992 = vset.pattern.permute.xlu1 %v2236_v1  ;;  %233 = vperm.xlu0 %1990, %v2366_v7   ;;  %v2064_v40 = vld [vmem:[#allocation4 + $0x8] sm:$0xff]   ;;  %v2067_v44 = vld [vmem:[#allocation4 + $0x58] sm:$0xff]   ;;  %v2069_v48 = vld [vmem:[#allocation4 + $0x60] sm:$0xff]  }
  0x54   : > { %238 = vperm.xlu1 %1992, %v2369_v8   ;;  %615 = vmatpush1.bf16.msra.mxu0 %v2024_v15  ;;  %v2055_v45 = vld [vmem:[#allocation2 + $0x104] ss:$8 sps:$4 sm:$0xff]   ;;  %v2068_v46 = vld [vmem:[#allocation4 + $0x18] sm:$0xff]   ;;  %v2057_v47 = vld [vmem:[#allocation2 + $0x100] ss:$8 sps:$4 sm:$0xff]  }
  0x55   : > { %616 = vmatprep.subr.bf16.mxu0 %v2025_v16  ;;  %1877 = vmatpush3.bf16.msra.mxu1 %v2064_v40  ;;  %v2058_v49 = vld [vmem:[#allocation2 + $0x114] ss:$8 sps:$4 sm:$0xff]   ;;  %v2070_v50 = vld [vmem:[#allocation4 + $0x20] sm:$0xff]   ;;  %v2060_v51 = vld [vmem:[#allocation2 + $0x110] ss:$8 sps:$4 sm:$0xff]  }
  0x56   : > { %1878 = vmatprep.subr.bf16.mxu1 %v2065_v41  ;;  %v2071_v52 = vld [vmem:[#allocation4 + $0x68] sm:$0xff]   ;;  %v218_v55 = vld [vmem:[#allocation2] sm:$0x11]  ;;  %v215_v56 = vld [vmem:[#allocation2 + $0x10] sm:$0x11] }
  0x57   : > { %1993 = vset.pattern.permute.xlu0 %v2235_v0  ;;  %v219_v57 = vunpack.c.l.bf16 %v218_v55  ;;  %v220_v58 = vunpack.c.h.bf16 %v218_v55  ;;  %v216_v61 = vunpack.c.l.bf16 %v215_v56  ;;  %v217_v62 = vunpack.c.h.bf16 %v215_v56 }
  0x58   : > { %1994 = vset.pattern.permute.xlu1 %v2235_v0  ;;  %318 = vperm.xlu0 %1993, %v2366_v7  }
  0x59   : > { %322 = vperm.xlu1 %1994, %v2369_v8   ;;  %617 = vmatpush1.bf16.msra.mxu0 %v2027_v18  ;;  %v2411_v63 = vrot.slane %v219_v57, %v2406_v59  ;;  %v2414_v4 = vrot.slane %v220_v58, %v2406_v59  ;;  %v2417_v5 = vrot.slane %v219_v57, %v2408_v60 }
  0x5a   : > { %618 = vmatprep.subr.bf16.mxu0 %v2028_v19  ;;  %1879 = vmatpush3.bf16.msra.mxu1 %v2066_v42  ;;  %v2420_v6 = vrot.slane %v216_v61, %v2406_v59  ;;  %v2423_v9 = vrot.slane %v220_v58, %v2408_v60  ;;  %v2426_v11 = vrot.slane %v217_v62, %v2406_v59 }
  0x5b   : > { %1880 = vmatprep.subr.bf16.mxu1 %v2067_v44 }
  0x5c   : > { %1996 = vset.pattern.permute.xlu0 %v2236_v1 }
  0x5d   : > { %1995 = vset.pattern.permute.xlu1 %v2236_v1  ;;  %248 = vperm.xlu0 %1996, %v2382_v14  }
  0x5e   : > { %243 = vperm.xlu1 %1995, %v2379_v13   ;;  %619 = vmatpush1.bf16.msra.mxu0 %v2030_v20 }
  0x5f   : > { %620 = vmatprep.subr.bf16.mxu0 %v2031_v21  ;;  %1881 = vmatpush3.bf16.msra.mxu1 %v2068_v46 }
  0x60   : > { %1882 = vmatprep.subr.bf16.mxu1 %v2069_v48 }
  0x61   : > { %253 = vperm.xlu0 %1996, %v2389_v17  }
  0x62   : > { %1997 = vset.pattern.permute.xlu1 %v2235_v0  ;;  %621 = vmatpush1.bf16.msra.mxu0 %v2033_v22 }
  0x63   : > { %326 = vperm.xlu1 %1997, %v2379_v13   ;;  %622 = vmatprep.subr.bf16.mxu0 %v2034_v23 }
  0x64   : > { %1883 = vmatpush3.bf16.msra.mxu1 %v2070_v50 }
  0x65   : > { %1999 = vset.pattern.permute.xlu0 %v2235_v0  ;;  %1884 = vmatprep.subr.bf16.mxu1 %v2071_v52 }
  0x66   : > { %334 = vperm.xlu0 %1999, %v2389_v17   ;;  %623 = vmatpush1.bf16.msra.mxu0 %v2036_v25 }
  0x67   : > { %330 = vperm.xlu1 %1997, %v2382_v14   ;;  %624 = vmatprep.subr.bf16.mxu0 %v2037_v26 }
  0x6a   : > { %2003 = vset.pattern.permute.xlu0 %v2236_v1  ;;  %625 = vmatpush1.bf16.msra.mxu0 %v2039_v27 }
  0x6b   : > { %1998 = vset.pattern.permute.xlu1 %v2236_v1  ;;  %626 = vmatprep.subr.bf16.mxu0 %v2040_v28 }
  0x6c   : > { %258 = vperm.xlu1 %1998, %v2398_v24  }
  0x6e   : > { %627 = vmatpush1.bf16.msra.mxu0 %v2042_v29 }
  0x6f   : > { %628 = vmatprep.subr.bf16.mxu0 %v2043_v30 }
  0x70   : > { %2000 = vset.pattern.permute.xlu1 %v2235_v0 }
  0x71   : > { %338 = vperm.xlu1 %2000, %v2398_v24  }
  0x72   : > { %629 = vmatpush1.bf16.msra.mxu0 %v2045_v31 }
  0x73   : > { %630 = vmatprep.subr.bf16.mxu0 %v2046_v32 }
  0x75   : > { %2001 = vset.pattern.permute.xlu1 %v2236_v1 }
  0x76   : > { %631 = vmatpush1.bf16.msra.mxu0 %v2048_v33 }
  0x77   : > { %632 = vmatprep.subr.bf16.mxu0 %v2049_v37 }
  0x7a   : > { %633 = vmatpush1.bf16.msra.mxu0 %v2051_v38 }
  0x7b   : > { %634 = vmatprep.subr.bf16.mxu0 %v2052_v39 }
  0x7e   : > { %635 = vmatpush1.bf16.msra.mxu0 %v2054_v43 }
  0x7f   : > { %636 = vmatprep.subr.bf16.mxu0 %v2055_v45 }
  0x82   : > { %637 = vmatpush1.bf16.msra.mxu0 %v2057_v47 }
  0x83   : > { %638 = vmatprep.subr.bf16.mxu0 %v2058_v49 }
  0x86   : > { %639 = vmatpush1.bf16.msra.mxu0 %v2060_v51 }
  0xca   : > { %v311_v10 = vpop.permute.xlu1 %310  ;;  %v224_v12 = vpop.permute.xlu0 %223 }
  0xcb   : > { %v269_v15 = vmul.f32 %v2411_v63, %v224_v12  ;;  %v270_v16 = vmul.f32 %v2414_v4, %v224_v12  ;;  %v349_v18 = vmul.f32 %v2417_v5, %v311_v10  ;;  %v350_v20 = vmul.f32 %v2423_v9, %v311_v10 }
  0xcd   : > { %v293_v19 = vadd.f32 %v2420_v6, %v269_v15  ;;  %v294_v21 = vadd.f32 %v2426_v11, %v270_v16 }
  0xce   : > { %v315_v22 = vpop.permute.xlu1 %314  ;;  %v229_v23 = vpop.permute.xlu0 %228 }
  0xcf   : > { %v271_v25 = vmul.f32 %v2411_v63, %v229_v23  ;;  %v272_v26 = vmul.f32 %v2414_v4, %v229_v23  ;;  %v365_v27 = vadd.f32 %v349_v18, %v293_v19  ;;  %v351_v28 = vmul.f32 %v2417_v5, %v315_v22 }
  0xd0   : > { %v352_v30 = vmul.f32 %v2423_v9, %v315_v22  ;;  %v366_v33 = vadd.f32 %v350_v20, %v294_v21 }
  0xd1   : > { %v295_v29 = vadd.f32 %v2420_v6, %v271_v25  ;;  %v296_v31 = vadd.f32 %v2426_v11, %v272_v26  ;;  %v381_v41 = vmax.f32 %v365_v27, 0.0 }
  0xd2   : > { %v234_v32 = vpop.permute.xlu0 %233  ;;  %v382_v43 = vmax.f32 %v366_v33, 0.0 }
  0xd3   : > { %v367_v34 = vadd.f32 %v351_v28, %v295_v29  ;;  %v273_v35 = vmul.f32 %v2411_v63, %v234_v32  ;;  %v239_v36 = vpop.permute.xlu1 %238  ;;  %v274_v37 = vmul.f32 %v2414_v4, %v234_v32  ;;  %v368_v40 = vadd.f32 %v352_v30, %v296_v31 }
  0xd4   : > { %v275_v38 = vmul.f32 %v2411_v63, %v239_v36  ;;  %v276_v39 = vmul.f32 %v2414_v4, %v239_v36 }
  0xd5   : > { %v383_v42 = vmax.f32 %v367_v34, 0.0  ;;  %v384_v44 = vmax.f32 %v368_v40, 0.0  ;;  %v297_v45 = vadd.f32 %v2420_v6, %v273_v35  ;;  %v298_v50 = vadd.f32 %v2426_v11, %v274_v37 }
  0xd6   : > { %v299_v46 = vadd.f32 %v2420_v6, %v275_v38  ;;  %v300_v47 = vadd.f32 %v2426_v11, %v276_v39 }
  0xd7   : > { %v319_v48 = vpop.permute.xlu0 %318  ;;  %v429_v49 = vpack.c.bf16 %v383_v42, %v381_v41  ;;  %v430_v54 = vpack.c.bf16 %v384_v44, %v382_v43 }
  0xd8   : > { %v353_v51 = vmul.f32 %v2417_v5, %v319_v48  ;;  %v354_v52 = vmul.f32 %v2423_v9, %v319_v48  ;;  %v323_v53 = vpop.permute.xlu1 %322 }
  0xd9   : > { %v355_v55 = vmul.f32 %v2417_v5, %v323_v53  ;;  %v356_v56 = vmul.f32 %v2423_v9, %v323_v53  ;;  %640 = vmatprep.mubr.bf16.mxu0 %v430_v54 }
  0xda   : > { %v369_v57 = vadd.f32 %v353_v51, %v297_v45  ;;  %v370_v58 = vadd.f32 %v354_v52, %v298_v50  ;;  %641 = vmatmul.mubr.bf16.vlgmr.msra.gmra.mrb[0].mxu0 %v429_v49 }
  0xdb   : > { %v371_v61 = vadd.f32 %v355_v55, %v299_v46  ;;  %v372_v62 = vadd.f32 %v356_v56, %v300_v47 }
  0xdc   : > { %v385_v10 = vmax.f32 %v369_v57, 0.0  ;;  %v386_v12 = vmax.f32 %v370_v58, 0.0  ;;  %v249_v19 = vpop.permute.xlu0 %248 }
  0xdd   : > { %v387_v15 = vmax.f32 %v371_v61, 0.0  ;;  %v388_v16 = vmax.f32 %v372_v62, 0.0  ;;  %v244_v18 = vpop.permute.xlu1 %243  ;;  %v279_v25 = vmul.f32 %v2411_v63, %v249_v19  ;;  %v280_v26 = vmul.f32 %v2414_v4, %v249_v19 }
  0xde   : > { %v277_v20 = vmul.f32 %v2411_v63, %v244_v18  ;;  %v278_v21 = vmul.f32 %v2414_v4, %v244_v18 }
  0xdf   : > { %v432_v22 = vpack.c.bf16 %v388_v16, %v386_v12  ;;  %v431_v23 = vpack.c.bf16 %v387_v15, %v385_v10  ;;  %v303_v33 = vadd.f32 %v2420_v6, %v279_v25  ;;  %v304_v34 = vadd.f32 %v2426_v11, %v280_v26  ;;  %v2074_v25 = vld [vmem:[#allocation4 + $0x30] sm:$0xff]   ;;  %v2075_v26 = vld [vmem:[#allocation4 + $0x78] sm:$0xff]  }
  0xe0   : > { %v301_v28 = vadd.f32 %v2420_v6, %v277_v20  ;;  %v302_v29 = vadd.f32 %v2426_v11, %v278_v21  ;;  %v254_v32 = vpop.permute.xlu0 %253 }
  0xe1   : > { %650 = vmatprep.mubr.bf16.mxu0 %v432_v22  ;;  %v281_v40 = vmul.f32 %v2411_v63, %v254_v32  ;;  %v282_v41 = vmul.f32 %v2414_v4, %v254_v32 }
  0xe2   : > { %v327_v27 = vpop.permute.xlu1 %326  ;;  %651 = vmatmul.mubr.bf16.gmra.mrb[4].mxu0 %v431_v23 }
  0xe3   : > { %v357_v30 = vmul.f32 %v2417_v5, %v327_v27  ;;  %v358_v31 = vmul.f32 %v2423_v9, %v327_v27  ;;  %v305_v50 = vadd.f32 %v2420_v6, %v281_v40  ;;  %v306_v51 = vadd.f32 %v2426_v11, %v282_v41 }
  0xe5   : > { %v373_v36 = vadd.f32 %v357_v30, %v301_v28  ;;  %v374_v37 = vadd.f32 %v358_v31, %v302_v29  ;;  %v335_v44 = vpop.permute.xlu0 %334 }
  0xe6   : > { %v331_v35 = vpop.permute.xlu1 %330  ;;  %v361_v54 = vmul.f32 %v2417_v5, %v335_v44  ;;  %v362_v55 = vmul.f32 %v2423_v9, %v335_v44 }
  0xe7   : > { %v359_v38 = vmul.f32 %v2417_v5, %v331_v35  ;;  %v360_v39 = vmul.f32 %v2423_v9, %v331_v35  ;;  %v389_v45 = vmax.f32 %v373_v36, 0.0  ;;  %v390_v46 = vmax.f32 %v374_v37, 0.0 }
  0xe8   : > { %v377_v10 = vadd.f32 %v361_v54, %v305_v50  ;;  %v378_v12 = vadd.f32 %v362_v55, %v306_v51 }
  0xe9   : > { %v375_v42 = vadd.f32 %v359_v38, %v303_v33  ;;  %v376_v43 = vadd.f32 %v360_v39, %v304_v34 }
  0xea   : > { %v393_v18 = vmax.f32 %v377_v10, 0.0  ;;  %v394_v19 = vmax.f32 %v378_v12, 0.0 }
  0xeb   : > { %v391_v47 = vmax.f32 %v375_v42, 0.0  ;;  %v392_v48 = vmax.f32 %v376_v43, 0.0  ;;  %v259_v49 = vpop.permute.xlu1 %258 }
  0xec   : > { %v283_v52 = vmul.f32 %v2411_v63, %v259_v49  ;;  %v284_v53 = vmul.f32 %v2414_v4, %v259_v49 }
  0xed   : > { %v434_v56 = vpack.c.bf16 %v392_v48, %v390_v46  ;;  %v433_v57 = vpack.c.bf16 %v391_v47, %v389_v45 }
  0xee   : > { %v307_v58 = vadd.f32 %v2420_v6, %v283_v52  ;;  %v308_v61 = vadd.f32 %v2426_v11, %v284_v53  ;;  %v2072_v6 = vld [vmem:[#allocation4 + $0x28] sm:$0xff]   ;;  %v2073_v11 = vld [vmem:[#allocation4 + $0x70] sm:$0xff]  }
  0xef   : > { %660 = vmatprep.mubr.bf16.mxu0 %v434_v56  ;;  %1885 = vmatpush3.bf16.msra.mxu1 %v2072_v6 }
  0xf0   : > { %v339_v62 = vpop.permute.xlu1 %338  ;;  %661 = vmatmul.mubr.bf16.gmra.mrb[8].mxu0 %v433_v57  ;;  %1886 = vmatprep.subr.bf16.mxu1 %v2073_v11 }
  0xf1   : > { %v363_v15 = vmul.f32 %v2417_v5, %v339_v62  ;;  %v364_v63 = vmul.f32 %v2423_v9, %v339_v62  ;;  %v2076_v5 = vld [vmem:[#allocation4 + $0x38] sm:$0xff]   ;;  %v437_v9 = vld [vmem:[#allocation2 + $0x120] sm:$0x11] }
  0xf2   : > { %v438_v27 = vunpack.c.l.bf16 %v437_v9  ;;  %v439_v28 = vunpack.c.h.bf16 %v437_v9 }
  0xf3   : > { %v379_v4 = vadd.f32 %v363_v15, %v307_v58  ;;  %v380_v16 = vadd.f32 %v364_v63, %v308_v61  ;;  %1887 = vmatpush3.bf16.msra.mxu1 %v2074_v25 }
  0xf4   : > { %1888 = vmatprep.subr.bf16.mxu1 %v2075_v26  ;;  %v443_v29 = vrot.slane %v438_v27, %v2406_v59  ;;  %v447_v30 = vrot.slane %v439_v28, %v2406_v59 }
  0xf5   : > { %v395_v20 = vmax.f32 %v379_v4, 0.0  ;;  %v396_v21 = vmax.f32 %v380_v16, 0.0 }
  0xf7   : > { %v436_v22 = vpack.c.bf16 %v396_v21, %v394_v19  ;;  %v435_v23 = vpack.c.bf16 %v395_v20, %v393_v18  ;;  %1889 = vmatpush3.bf16.msra.mxu1 %v2076_v5 }
  0xf9   : > { %670 = vmatprep.mubr.bf16.mxu0 %v436_v22 }
  0xfa   : > { %671 = vmatmul.mubr.bf16.gmra.mrb[12].mxu0 %v435_v23 }
 0x1ad   : > { %v642_v31 = vpop.f32.mrb[0].mxu0 }
 0x1ae   : > { %v643_v32 = vadd.f32 %v642_v31, %v443_v29  ;;  %v644_v33 = vpop.f32.mrb[1].mxu0 }
 0x1af   : > { %v645_v34 = vadd.f32 %v644_v33, %v447_v30  ;;  %v646_v35 = vpop.f32.mrb[2].mxu0 }
 0x1b0   : > { %v647_v36 = vadd.f32 %v646_v35, %v443_v29  ;;  %v648_v37 = vpop.f32.mrb[3].mxu0  ;;  %v681_v39 = vmax.f32 %v643_v32, 0.0 }
 0x1b1   : > { %v649_v38 = vadd.f32 %v648_v37, %v447_v30  ;;  %v682_v41 = vmax.f32 %v645_v34, 0.0  ;;  %v737_v37 = vld [vmem:[#allocation4 + $0x80] sm:$0x1] }
 0x1b2   : > { %v683_v40 = vmax.f32 %v647_v36, 0.0 }
 0x1b3   : > { %v684_v42 = vmax.f32 %v649_v38, 0.0  ;;  %v738_v38 = vunpack.c.l.bf16 %v737_v37 }
 0x1b4   : > { %v729_v43 = vpack.c.bf16 %v683_v40, %v681_v39 }
 0x1b5   : > { %v652_v44 = vpop.f32.mrb[4].mxu0  ;;  %v730_v45 = vpack.c.bf16 %v684_v42, %v682_v41  ;;  %v2480_v40 = vrot.slane %v738_v38, %v2406_v59 }
 0x1b6   : > { %v653_v46 = vadd.f32 %v652_v44, %v443_v29  ;;  %v654_v47 = vpop.f32.mrb[5].mxu0 }
 0x1b7   : > { %v655_v48 = vadd.f32 %v654_v47, %v447_v30  ;;  %v656_v49 = vpop.f32.mrb[6].mxu0  ;;  %871 = vmatprep.mubr.bf16.mxu1 %v730_v45 }
 0x1b8   : > { %v657_v50 = vadd.f32 %v656_v49, %v443_v29  ;;  %v658_v51 = vpop.f32.mrb[7].mxu0  ;;  %872 = vmatmul.mubr.bf16.vlgmr.msra.gmra.mrb[0].mxu1 %v729_v43  ;;  %v685_v53 = vmax.f32 %v653_v46, 0.0 }
 0x1b9   : > { %v659_v52 = vadd.f32 %v658_v51, %v447_v30  ;;  %v686_v55 = vmax.f32 %v655_v48, 0.0 }
 0x1ba   : > { %v687_v54 = vmax.f32 %v657_v50, 0.0 }
 0x1bb   : > { %v688_v56 = vmax.f32 %v659_v52, 0.0 }
 0x1bc   : > { %v731_v57 = vpack.c.bf16 %v687_v54, %v685_v53 }
 0x1bd   : > { %v732_v58 = vpack.c.bf16 %v688_v56, %v686_v55 }
 0x1bf   : > { %879 = vmatprep.mubr.bf16.mxu1 %v732_v58 }
 0x1c0   : > { %880 = vmatmul.mubr.bf16.gmra.mrb[4].mxu1 %v731_v57 }
 0x1c3   : > { %v662_v61 = vpop.f32.mrb[8].mxu0 }
 0x1c4   : > { %v663_v62 = vadd.f32 %v662_v61, %v443_v29  ;;  %v664_v10 = vpop.f32.mrb[9].mxu0 }
 0x1c5   : > { %v665_v12 = vadd.f32 %v664_v10, %v447_v30  ;;  %v666_v15 = vpop.f32.mrb[10].mxu0 }
 0x1c6   : > { %v667_v63 = vadd.f32 %v666_v15, %v443_v29  ;;  %v668_v4 = vpop.f32.mrb[11].mxu0  ;;  %v689_v18 = vmax.f32 %v663_v62, 0.0 }
 0x1c7   : > { %v669_v16 = vadd.f32 %v668_v4, %v447_v30  ;;  %v690_v20 = vmax.f32 %v665_v12, 0.0 }
 0x1c8   : > { %v691_v19 = vmax.f32 %v667_v63, 0.0 }
 0x1c9   : > { %v692_v21 = vmax.f32 %v669_v16, 0.0 }
 0x1ca   : > { %v733_v22 = vpack.c.bf16 %v691_v19, %v689_v18 }
 0x1cb   : > { %v734_v23 = vpack.c.bf16 %v692_v21, %v690_v20 }
 0x1cd   : > { %v672_v6 = vpop.f32.mrb[12].mxu0  ;;  %887 = vmatprep.mubr.bf16.mxu1 %v734_v23 }
 0x1ce   : > { %v673_v11 = vadd.f32 %v672_v6, %v443_v29  ;;  %v674_v25 = vpop.f32.mrb[13].mxu0  ;;  %888 = vmatmul.mubr.bf16.gmra.mrb[8].mxu1 %v733_v22 }
 0x1cf   : > { %v675_v26 = vadd.f32 %v674_v25, %v447_v30  ;;  %v676_v5 = vpop.f32.mrb[14].mxu0 }
 0x1d0   : > { %v677_v9 = vadd.f32 %v676_v5, %v443_v29  ;;  %v678_v27 = vpop.f32.mrb[15].mxu0  ;;  %v693_v31 = vmax.f32 %v673_v11, 0.0 }
 0x1d1   : > { %v679_v28 = vadd.f32 %v678_v27, %v447_v30  ;;  %v694_v33 = vmax.f32 %v675_v26, 0.0 }
 0x1d2   : > { %v695_v32 = vmax.f32 %v677_v9, 0.0 }
 0x1d3   : > { %v696_v34 = vmax.f32 %v679_v28, 0.0 }
 0x1d4   : > { %v735_v35 = vpack.c.bf16 %v695_v32, %v693_v31 }
 0x1d5   : > { %v736_v36 = vpack.c.bf16 %v696_v34, %v694_v33 }
 0x1d7   : > { %895 = vmatprep.mubr.bf16.mxu1 %v736_v36 }
 0x1d8   : > { %896 = vmatmul.mubr.bf16.gmra.mrb[12].mxu1 %v735_v35 }
 0x28b   : > { %v1890_v39 = vpop.f32.mrb[0].mxu1 }
 0x28c   : > { %v1891_v41 = vpop.f32.mrb[1].mxu1 }
 0x28d   : > { %v1892_v42 = vadd.f32 %v1891_v41, %v1890_v39  ;;  %v1893_v29 = vpop.f32.mrb[2].mxu1 }
 0x28e   : > { %v1894_v30 = vpop.f32.mrb[3].mxu1 }
 0x28f   : > { %v2488_v43 = vadd.f32 %v1892_v42, %v2480_v40  ;;  %v1895_v44 = vadd.f32 %v1894_v30, %v1893_v29 }
 0x291   : > { %v904_v45 = vmul.f32 0.5, %v2488_v43  ;;  %1665 = vst [vmem:[%s2485_s27] sm:$0xff] %v2488_v43  ;;  %v2494_v46 = vadd.f32 %v1895_v44, %v2480_v40 }
 0x293   : > { %v912_v47 = vmul.f32 1.442695, %v904_v45  ;;  %v905_v48 = vmul.f32 0.5, %v2494_v46  ;;  %1666 = vst [vmem:[%s2485_s27 + $0x10] sm:$0xff] %v2494_v46  ;;  %v1896_v49 = vpop.f32.mrb[4].mxu1 }
 0x294   : > { %v1897_v50 = vpop.f32.mrb[5].mxu1 }
 0x295   : > { %2141 = vpow2.f32 %v912_v47  ;;  %v914_v51 = vmul.f32 1.442695, %v905_v48  ;;  %v1898_v52 = vadd.f32 %v1897_v50, %v1896_v49  ;;  %v1899_v53 = vpop.f32.mrb[6].mxu1  ;;  %v2077_v48 = vld [vmem:[#allocation2 + $0x150] ss:$8 sps:$4 sm:$0xff]  }
 0x296   : > { %v1900_v54 = vpop.f32.mrb[7].mxu1  ;;  %v2079_v49 = vld [vmem:[#allocation2 + $0x154] ss:$8 sps:$4 sm:$0xff]   ;;  %v2080_v50 = vld [vmem:[#allocation2 + $0x160] ss:$8 sps:$4 sm:$0xff]  }
 0x297   : > { %2143 = vpow2.f32 %v914_v51  ;;  %v2500_v55 = vadd.f32 %v1898_v52, %v2480_v40  ;;  %v1901_v56 = vadd.f32 %v1900_v54, %v1899_v53  ;;  %1369 = vmatprep.subr.bf16.mxu1 %v2079_v49  ;;  %v2083_v51 = vld [vmem:[#allocation2 + $0x170] ss:$8 sps:$4 sm:$0xff]   ;;  %v2088_v52 = vld [vmem:[#allocation2 + $0x184] ss:$8 sps:$4 sm:$0xff]   ;;  %v2091_v53 = vld [vmem:[#allocation2 + $0x194] ss:$8 sps:$4 sm:$0xff]  }
 0x298   : > { %1370 = vmatpush1.bf16.msra.mxu1 %v2077_v48  ;;  %v2094_v54 = vld [vmem:[#allocation2 + $0x1a4] ss:$8 sps:$4 sm:$0xff]  }
 0x299   : > { %v906_v57 = vmul.f32 0.5, %v2500_v55  ;;  %1667 = vst [vmem:[%s2485_s27 + $0x20] sm:$0xff] %v2500_v55  ;;  %v2506_v58 = vadd.f32 %v1901_v56, %v2480_v40  ;;  %v2092_v56 = vld [vmem:[#allocation2 + $0x1a0] ss:$8 sps:$4 sm:$0xff]  }
 0x29a   : > { %v976_v48 = vld [vmem:[#allocation2 + $0x140] sm:$0x11] }
 0x29b   : > { %v916_v61 = vmul.f32 1.442695, %v906_v57  ;;  %v907_v62 = vmul.f32 0.5, %v2506_v58  ;;  %1668 = vst [vmem:[%s2485_s27 + $0x30] sm:$0xff] %v2506_v58  ;;  %v2097_v57 = vld [vmem:[#allocation2 + $0x1b4] ss:$8 sps:$4 sm:$0xff]   ;;  %v977_v49 = vunpack.c.l.bf16 %v976_v48 }
 0x29d   : > { %2145 = vpow2.f32 %v916_v61  ;;  %v918_v10 = vmul.f32 1.442695, %v907_v62  ;;  %v2095_v61 = vld [vmem:[#allocation2 + $0x1b0] ss:$8 sps:$4 sm:$0xff]   ;;  %v2100_v62 = vld [vmem:[#allocation2 + $0x1c4] ss:$8 sps:$4 sm:$0xff]  }
 0x29f   : > { %v2142_v12 = vpop.eup %2141  ;;  %2147 = vpow2.f32 %v918_v10  ;;  %v2098_v10 = vld [vmem:[#allocation2 + $0x1c0] ss:$8 sps:$4 sm:$0xff]  }
 0x2a0   : > { %v928_v63 = vmul.f32 %v2142_v12, %v2356_v2  ;;  %v2103_v12 = vld [vmem:[#allocation2 + $0x1d4] ss:$8 sps:$4 sm:$0xff]  }
 0x2a1   : > { %v1902_v15 = vpop.f32.mrb[8].mxu1  ;;  %v2144_v4 = vpop.eup %2143 }
 0x2a2   : > { %v1903_v16 = vpop.f32.mrb[9].mxu1  ;;  %944 = vrot.lane.b32.xlu1 %v928_v63, %s2237_s28  ;;  %v929_v20 = vmul.f32 %v2144_v4, %v2361_v3  ;;  %v2106_v63 = vld [vmem:[#allocation2 + $0x1e4] ss:$8 sps:$4 sm:$0xff]   ;;  %v2104_v4 = vld [vmem:[#allocation2 + $0x1e0] ss:$8 sps:$4 sm:$0xff]  }
 0x2a3   : > { %v1904_v18 = vadd.f32 %v1903_v16, %v1902_v15  ;;  %v1905_v19 = vpop.f32.mrb[10].mxu1  ;;  %v2101_v15 = vld [vmem:[#allocation2 + $0x1d0] ss:$8 sps:$4 sm:$0xff]   ;;  %v2109_v16 = vld [vmem:[#allocation2 + $0x1f4] ss:$8 sps:$4 sm:$0xff]  }
 0x2a4   : > { %v1906_v21 = vpop.f32.mrb[11].mxu1  ;;  %946 = vrot.lane.b32.xlu0 %v929_v20, %s2237_s28  ;;  %v2110_v20 = vld [vmem:[#allocation2 + $0x200] ss:$8 sps:$4 sm:$0xff]  }
 0x2a5   : > { %v2515_v22 = vadd.f32 %v1904_v18, %v2480_v40  ;;  %v1907_v23 = vadd.f32 %v1906_v21, %v1905_v19  ;;  %v2107_v18 = vld [vmem:[#allocation2 + $0x1f0] ss:$8 sps:$4 sm:$0xff]   ;;  %v2112_v19 = vld [vmem:[#allocation2 + $0x204] ss:$8 sps:$4 sm:$0xff]  }
 0x2a7   : > { %v908_v6 = vmul.f32 0.5, %v2515_v22  ;;  %1669 = vst [vmem:[%s2485_s27 + $0x40] sm:$0xff] %v2515_v22  ;;  %v2522_v2 = vadd.f32 %v1907_v23, %v2480_v40  ;;  %v2146_v11 = vpop.eup %2145 }
 0x2a8   : > { %v930_v3 = vmul.f32 %v2146_v11, %v2366_v7 }
 0x2a9   : > { %v920_v25 = vmul.f32 1.442695, %v908_v6  ;;  %v909_v26 = vmul.f32 0.5, %v2522_v2  ;;  %1670 = vst [vmem:[%s2485_s27 + $0x50] sm:$0xff] %v2522_v2  ;;  %v2148_v5 = vpop.eup %2147 }
 0x2aa   : > { %948 = vrot.lane.b32.xlu1 %v930_v3, %s2237_s28  ;;  %v931_v28 = vmul.f32 %v2148_v5, %v2369_v8  ;;  %v2118_v3 = vld [vmem:[#allocation2 + $0x224] ss:$8 sps:$4 sm:$0xff]  }
 0x2ab   : > { %2149 = vpow2.f32 %v920_v25  ;;  %v922_v9 = vmul.f32 1.442695, %v909_v26  ;;  %v1908_v27 = vpop.f32.mrb[12].mxu1  ;;  %v2115_v25 = vld [vmem:[#allocation2 + $0x214] ss:$8 sps:$4 sm:$0xff]  }
 0x2ac   : > { %v1909_v31 = vpop.f32.mrb[13].mxu1  ;;  %950 = vrot.lane.b32.xlu0 %v931_v28, %s2237_s28  ;;  %v2113_v26 = vld [vmem:[#allocation2 + $0x210] ss:$8 sps:$4 sm:$0xff]  }
 0x2ad   : > { %2151 = vpow2.f32 %v922_v9  ;;  %v1910_v32 = vadd.f32 %v1909_v31, %v1908_v27  ;;  %v1911_v33 = vpop.f32.mrb[14].mxu1  ;;  %v2116_v9 = vld [vmem:[#allocation2 + $0x220] ss:$8 sps:$4 sm:$0xff]  }
 0x2ae   : > { %v1912_v34 = vpop.f32.mrb[15].mxu1 }
 0x2af   : > { %v2532_v35 = vadd.f32 %v1910_v32, %v2480_v40  ;;  %v1913_v7 = vadd.f32 %v1912_v34, %v1911_v33  ;;  %v2124_v32 = vld [vmem:[#allocation2 + $0x244] ss:$8 sps:$4 sm:$0xff]   ;;  %v2122_v33 = vld [vmem:[#allocation2 + $0x240] ss:$8 sps:$4 sm:$0xff]  }
 0x2b1   : > { %v910_v36 = vmul.f32 0.5, %v2532_v35  ;;  %1671 = vst [vmem:[%s2485_s27 + $0x60] sm:$0xff] %v2532_v35  ;;  %v2538_v37 = vadd.f32 %v1913_v7, %v2480_v40 }
 0x2b3   : > { %v924_v38 = vmul.f32 1.442695, %v910_v36  ;;  %v911_v8 = vmul.f32 0.5, %v2538_v37  ;;  %1672 = vst [vmem:[%s2485_s27 + $0x70] sm:$0xff] %v2538_v37 }
 0x2b5   : > { %v2150_v39 = vpop.eup %2149  ;;  %2153 = vpow2.f32 %v924_v38  ;;  %v926_v41 = vmul.f32 1.442695, %v911_v8 }
 0x2b6   : > { %v932_v42 = vmul.f32 %v2150_v39, %v2379_v13  ;;  %v2082_v13 = vld [vmem:[#allocation2 + $0x164] ss:$8 sps:$4 sm:$0xff]  }
 0x2b7   : > { %v2152_v29 = vpop.eup %2151  ;;  %2155 = vpow2.f32 %v926_v41  ;;  %1371 = vmatprep.subr.bf16.mxu1 %v2082_v13  ;;  %v2127_v41 = vld [vmem:[#allocation4 + $0xd0] sm:$0xff]   ;;  %v978_v13 = vunpack.c.h.bf16 %v976_v48 }
 0x2b8   : > { %952 = vrot.lane.b32.xlu1 %v932_v42, %s2237_s28  ;;  %v933_v30 = vmul.f32 %v2152_v29, %v2382_v14  ;;  %v2085_v14 = vld [vmem:[#allocation2 + $0x174] ss:$8 sps:$4 sm:$0xff]   ;;  %1372 = vmatpush1.bf16.msra.mxu1 %v2080_v50 }
 0x2b9   : > { %1373 = vmatprep.subr.bf16.mxu1 %v2085_v14  ;;  %v2129_v42 = vld [vmem:[#allocation4 + $0xd8] sm:$0xff]  }
 0x2ba   : > { %954 = vrot.lane.b32.xlu0 %v933_v30, %s2237_s28  ;;  %v2130_v29 = vld [vmem:[#allocation4 + $0x98] sm:$0xff]   ;;  %v2131_v30 = vld [vmem:[#allocation4 + $0xe0] sm:$0xff]  }
 0x2bc   : > { %1374 = vmatpush1.bf16.msra.mxu1 %v2083_v51 }
 0x2bd   : > { %1375 = vmatprep.subr.bf16.mxu1 %v2088_v52 }
 0x2bf   : > { %v2154_v40 = vpop.eup %2153 }
 0x2c0   : > { %v934_v44 = vmul.f32 %v2154_v40, %v2389_v17  ;;  %v2086_v17 = vld [vmem:[#allocation2 + $0x180] ss:$8 sps:$4 sm:$0xff]  }
 0x2c1   : > { %v2156_v45 = vpop.eup %2155  ;;  %1376 = vmatpush1.bf16.msra.mxu1 %v2086_v17  ;;  %v2134_v40 = vld [vmem:[#allocation4 + $0xa8] sm:$0xff]  }
 0x2c2   : > { %956 = vrot.lane.b32.xlu1 %v934_v44, %s2237_s28  ;;  %v935_v47 = vmul.f32 %v2156_v45, %v2398_v24  ;;  %v2089_v24 = vld [vmem:[#allocation2 + $0x190] ss:$8 sps:$4 sm:$0xff]   ;;  %1377 = vmatprep.subr.bf16.mxu1 %v2091_v53 }
 0x2c3   : > { %v979_v44 = vld [vmem:[#allocation2 + $0x130] sm:$0x11] }
 0x2c4   : > { %958 = vrot.lane.b32.xlu0 %v935_v47, %s2237_s28  ;;  %v980_v45 = vunpack.c.l.bf16 %v979_v44  ;;  %v981_v47 = vunpack.c.h.bf16 %v979_v44 }
 0x2c5   : > { %1378 = vmatpush1.bf16.msra.mxu1 %v2089_v24  ;;  %v2582_v24 = vrot.slane %v977_v49, %v2406_v59 }
 0x2c6   : > { %1379 = vmatprep.subr.bf16.mxu1 %v2094_v54  ;;  %v2570_v50 = vrot.slane %v980_v45, %v2406_v59  ;;  %v2573_v14 = vrot.slane %v981_v47, %v2406_v59  ;;  %v2576_v17 = vrot.slane %v980_v45, %v2408_v60  ;;  %v2579_v53 = vrot.slane %v981_v47, %v2408_v60 }
 0x2c7   : > { %v2585_v54 = vrot.slane %v978_v13, %v2406_v59 }
 0x2c9   : > { %1380 = vmatpush1.bf16.msra.mxu1 %v2092_v56 }
 0x2ca   : > { %1381 = vmatprep.subr.bf16.mxu1 %v2097_v57 }
 0x2cd   : > { %1382 = vmatpush1.bf16.msra.mxu1 %v2095_v61 }
 0x2ce   : > { %1383 = vmatprep.subr.bf16.mxu1 %v2100_v62 }
 0x2d1   : > { %1384 = vmatpush1.bf16.msra.mxu1 %v2098_v10 }
 0x2d2   : > { %1385 = vmatprep.subr.bf16.mxu1 %v2103_v12 }
 0x2d5   : > { %1386 = vmatpush1.bf16.msra.mxu1 %v2101_v15 }
 0x2d6   : > { %1387 = vmatprep.subr.bf16.mxu1 %v2106_v63 }
 0x2d9   : > { %1388 = vmatpush1.bf16.msra.mxu1 %v2104_v4 }
 0x2da   : > { %1389 = vmatprep.subr.bf16.mxu1 %v2109_v16 }
 0x2dd   : > { %1390 = vmatpush1.bf16.msra.mxu1 %v2107_v18 }
 0x2de   : > { %1391 = vmatprep.subr.bf16.mxu1 %v2112_v19 }
 0x2e1   : > { %1392 = vmatpush1.bf16.msra.mxu1 %v2110_v20 }
 0x2e2   : > { %1393 = vmatprep.subr.bf16.mxu1 %v2115_v25 }
 0x2e5   : > { %1394 = vmatpush1.bf16.msra.mxu1 %v2113_v26 }
 0x2e6   : > { %1395 = vmatprep.subr.bf16.mxu1 %v2118_v3 }
 0x2e9   : > { %1396 = vmatpush1.bf16.msra.mxu1 %v2116_v9 }
 0x314   : > { %v945_v21 = vpop.permute.xlu1 %944 }
 0x315   : > { %v968_v23 = vadd.f32 %v945_v21, %v2488_v43  ;;  %v2121_v43 = vld [vmem:[#allocation2 + $0x234] ss:$8 sps:$4 sm:$0xff]  }
 0x316   : > { %v947_v6 = vpop.permute.xlu0 %946  ;;  %1397 = vmatprep.subr.bf16.mxu1 %v2121_v43 }
 0x317   : > { %v969_v11 = vadd.f32 %v947_v6, %v2494_v46  ;;  %984 = vperm.xlu1 %2001, %v968_v23   ;;  %v2119_v46 = vld [vmem:[#allocation2 + $0x230] ss:$8 sps:$4 sm:$0xff]  }
 0x318   : > { %1398 = vmatpush1.bf16.msra.mxu1 %v2119_v46 }
 0x319   : > { %989 = vperm.xlu0 %2003, %v969_v11   ;;  %1399 = vmatprep.subr.bf16.mxu1 %v2124_v32 }
 0x31b   : > { %2002 = vset.pattern.permute.xlu1 %v2235_v0 }
 0x31c   : > { %v949_v5 = vpop.permute.xlu1 %948  ;;  %1071 = vperm.xlu1 %2002, %v968_v23   ;;  %1400 = vmatpush1.bf16.msra.mxu1 %v2122_v33 }
 0x31d   : > { %v970_v27 = vadd.f32 %v949_v5, %v2500_v55 }
 0x31e   : > { %v951_v28 = vpop.permute.xlu0 %950 }
 0x31f   : > { %994 = vperm.xlu0 %2003, %v970_v27   ;;  %v971_v31 = vadd.f32 %v951_v28, %v2506_v58 }
 0x320   : > { %1075 = vperm.xlu1 %2002, %v969_v11  }
 0x323   : > { %2004 = vset.pattern.permute.xlu0 %v2235_v0 }
 0x324   : > { %2005 = vset.pattern.permute.xlu1 %v2236_v1  ;;  %1079 = vperm.xlu0 %2004, %v970_v27  }
 0x325   : > { %999 = vperm.xlu1 %2005, %v971_v31  }
 0x328   : > { %2009 = vset.pattern.permute.xlu0 %v2236_v1 }
 0x329   : > { %2006 = vset.pattern.permute.xlu1 %v2235_v0 }
 0x32a   : > { %v953_v55 = vpop.permute.xlu1 %952  ;;  %1083 = vperm.xlu1 %2006, %v971_v31  }
 0x32b   : > { %v972_v58 = vadd.f32 %v953_v55, %v2515_v22  ;;  %v2125_v22 = vld [vmem:[#allocation4 + $0xc8] sm:$0xff]  }
 0x32c   : > { %v955_v34 = vpop.permute.xlu0 %954  ;;  %1914 = vmatprep.subr.bf16.mxu0 %v2125_v22 }
 0x32d   : > { %v973_v7 = vadd.f32 %v955_v34, %v2522_v2  ;;  %v2126_v2 = vld [vmem:[#allocation4 + $0x88] sm:$0xff]  }
 0x32e   : > { %2007 = vset.pattern.permute.xlu1 %v2236_v1  ;;  %1915 = vmatpush3.bf16.msra.mxu0 %v2126_v2 }
 0x32f   : > { %1009 = vperm.xlu0 %2009, %v973_v7   ;;  %1004 = vperm.xlu1 %2007, %v972_v58  }
 0x330   : > { %1916 = vmatprep.subr.bf16.mxu0 %v2127_v41 }
 0x333   : > { %2008 = vset.pattern.permute.xlu1 %v2235_v0 }
 0x334   : > { %v957_v36 = vpop.permute.xlu1 %956  ;;  %1087 = vperm.xlu1 %2008, %v972_v58  }
 0x335   : > { %v974_v38 = vadd.f32 %v957_v36, %v2532_v35  ;;  %v2128_v35 = vld [vmem:[#allocation4 + $0x90] sm:$0xff]  }
 0x336   : > { %v959_v8 = vpop.permute.xlu0 %958  ;;  %1917 = vmatpush3.bf16.msra.mxu0 %v2128_v35 }
 0x337   : > { %1014 = vperm.xlu0 %2009, %v974_v38   ;;  %v975_v39 = vadd.f32 %v959_v8, %v2538_v37  ;;  %1918 = vmatprep.subr.bf16.mxu0 %v2129_v42  ;;  %v2132_v37 = vld [vmem:[#allocation4 + $0xa0] sm:$0xff]  }
 0x338   : > { %1091 = vperm.xlu1 %2008, %v973_v7  }
 0x33a   : > { %1919 = vmatpush3.bf16.msra.mxu0 %v2130_v29 }
 0x33b   : > { %2011 = vset.pattern.permute.xlu0 %v2235_v0  ;;  %1920 = vmatprep.subr.bf16.mxu0 %v2131_v30 }
 0x33c   : > { %1095 = vperm.xlu0 %2011, %v974_v38   ;;  %2010 = vset.pattern.permute.xlu1 %v2236_v1  ;;  %v2133_v1 = vld [vmem:[#allocation4 + $0xe8] sm:$0xff]  }
 0x33d   : > { %1019 = vperm.xlu1 %2010, %v975_v39  }
 0x33e   : > { %1921 = vmatpush3.bf16.msra.mxu0 %v2132_v37 }
 0x33f   : > { %1922 = vmatprep.subr.bf16.mxu0 %v2133_v1 }
 0x341   : > { %2012 = vset.pattern.permute.xlu1 %v2235_v0  ;;  %v2135_v0 = vld [vmem:[#allocation4 + $0xf0] sm:$0xff]  }
 0x342   : > { %1099 = vperm.xlu1 %2012, %v975_v39   ;;  %1923 = vmatpush3.bf16.msra.mxu0 %v2134_v40 }
 0x343   : > { %1924 = vmatprep.subr.bf16.mxu0 %v2135_v0 }
 0x396   : > { %v985_v51 = vpop.permute.xlu1 %984 }
 0x397   : > { %v1030_v56 = vmul.f32 %v2570_v50, %v985_v51  ;;  %v1031_v57 = vmul.f32 %v2573_v14, %v985_v51 }
 0x398   : > { %v990_v52 = vpop.permute.xlu0 %989 }
 0x399   : > { %v1032_v61 = vmul.f32 %v2570_v50, %v990_v52  ;;  %v1033_v62 = vmul.f32 %v2573_v14, %v990_v52  ;;  %v1054_v15 = vadd.f32 %v2582_v24, %v1030_v56  ;;  %v1055_v63 = vadd.f32 %v2585_v54, %v1031_v57 }
 0x39b   : > { %v1072_v10 = vpop.permute.xlu1 %1071  ;;  %v1056_v16 = vadd.f32 %v2582_v24, %v1032_v61  ;;  %v1057_v18 = vadd.f32 %v2585_v54, %v1033_v62 }
 0x39c   : > { %v1110_v12 = vmul.f32 %v2576_v17, %v1072_v10  ;;  %v1111_v60 = vmul.f32 %v2579_v53, %v1072_v10 }
 0x39e   : > { %v995_v4 = vpop.permute.xlu0 %994  ;;  %v1126_v20 = vadd.f32 %v1110_v12, %v1054_v15  ;;  %v1127_v21 = vadd.f32 %v1111_v60, %v1055_v63 }
 0x39f   : > { %v1076_v19 = vpop.permute.xlu1 %1075  ;;  %v1034_v26 = vmul.f32 %v2570_v50, %v995_v4  ;;  %v1035_v3 = vmul.f32 %v2573_v14, %v995_v4 }
 0x3a0   : > { %v1112_v23 = vmul.f32 %v2576_v17, %v1076_v19  ;;  %v1113_v6 = vmul.f32 %v2579_v53, %v1076_v19  ;;  %v1142_v9 = vmax.f32 %v1126_v20, 0.0  ;;  %v1143_v27 = vmax.f32 %v1127_v21, 0.0 }
 0x3a1   : > { %v1058_v58 = vadd.f32 %v2582_v24, %v1034_v26  ;;  %v1059_v36 = vadd.f32 %v2585_v54, %v1035_v3 }
 0x3a2   : > { %v1128_v11 = vadd.f32 %v1112_v23, %v1056_v16  ;;  %v1129_v25 = vadd.f32 %v1113_v6, %v1057_v18 }
 0x3a3   : > { %v1080_v5 = vpop.permute.xlu0 %1079 }
 0x3a4   : > { %v1144_v43 = vmax.f32 %v1128_v11, 0.0  ;;  %v1145_v28 = vmax.f32 %v1129_v25, 0.0  ;;  %v1000_v46 = vpop.permute.xlu1 %999  ;;  %v1114_v31 = vmul.f32 %v2576_v17, %v1080_v5  ;;  %v1115_v32 = vmul.f32 %v2579_v53, %v1080_v5 }
 0x3a5   : > { %v1036_v55 = vmul.f32 %v2570_v50, %v1000_v46  ;;  %v1037_v34 = vmul.f32 %v2573_v14, %v1000_v46 }
 0x3a6   : > { %v1190_v33 = vpack.c.bf16 %v1144_v43, %v1142_v9  ;;  %v1191_v7 = vpack.c.bf16 %v1145_v28, %v1143_v27  ;;  %v1130_v38 = vadd.f32 %v1114_v31, %v1058_v58  ;;  %v1131_v8 = vadd.f32 %v1115_v32, %v1059_v36 }
 0x3a7   : > { %v1060_v22 = vadd.f32 %v2582_v24, %v1036_v55  ;;  %v1061_v2 = vadd.f32 %v2585_v54, %v1037_v34 }
 0x3a8   : > { %1401 = vmatprep.mubr.bf16.mxu1 %v1191_v7  ;;  %v1146_v30 = vmax.f32 %v1130_v38, 0.0  ;;  %v1147_v37 = vmax.f32 %v1131_v8, 0.0 }
 0x3a9   : > { %v1084_v39 = vpop.permute.xlu1 %1083  ;;  %1402 = vmatmul.mubr.bf16.vlgmr.msra.gmra.mrb[16].mxu1 %v1190_v33 }
 0x3aa   : > { %v1116_v41 = vmul.f32 %v2576_v17, %v1084_v39  ;;  %v1117_v35 = vmul.f32 %v2579_v53, %v1084_v39 }
 0x3ac   : > { %v1132_v42 = vadd.f32 %v1116_v41, %v1060_v22  ;;  %v1133_v29 = vadd.f32 %v1117_v35, %v1061_v2 }
 0x3ae   : > { %v1148_v1 = vmax.f32 %v1132_v42, 0.0  ;;  %v1149_v40 = vmax.f32 %v1133_v29, 0.0  ;;  %v1005_v0 = vpop.permute.xlu1 %1004  ;;  %v1010_v47 = vpop.permute.xlu0 %1009  ;;  %v2136_v29 = vld [vmem:[#allocation4 + $0xb0] sm:$0xff]  }
 0x3af   : > { %v1038_v48 = vmul.f32 %v2570_v50, %v1005_v0  ;;  %v1039_v49 = vmul.f32 %v2573_v14, %v1005_v0  ;;  %v1040_v56 = vmul.f32 %v2570_v50, %v1010_v47  ;;  %v1041_v57 = vmul.f32 %v2573_v14, %v1010_v47  ;;  %1925 = vmatpush3.bf16.msra.mxu0 %v2136_v29 }
 0x3b0   : > { %v1193_v44 = vpack.c.bf16 %v1149_v40, %v1147_v37  ;;  %v1192_v45 = vpack.c.bf16 %v1148_v1, %v1146_v30  ;;  %v2138_v30 = vld [vmem:[#allocation4 + $0xb8] sm:$0xff]  }
 0x3b1   : > { %v1062_v62 = vadd.f32 %v2582_v24, %v1038_v48  ;;  %v1063_v10 = vadd.f32 %v2585_v54, %v1039_v49  ;;  %v1064_v63 = vadd.f32 %v2582_v24, %v1040_v56  ;;  %v1065_v4 = vadd.f32 %v2585_v54, %v1041_v57 }
 0x3b2   : > { %1411 = vmatprep.mubr.bf16.mxu1 %v1193_v44 }
 0x3b3   : > { %v1088_v13 = vpop.permute.xlu1 %1087  ;;  %1412 = vmatmul.mubr.bf16.gmra.mrb[20].mxu1 %v1192_v45 }
 0x3b4   : > { %v1118_v51 = vmul.f32 %v2576_v17, %v1088_v13  ;;  %v1119_v52 = vmul.f32 %v2579_v53, %v1088_v13 }
 0x3b6   : > { %v1015_v61 = vpop.permute.xlu0 %1014  ;;  %v1134_v60 = vadd.f32 %v1118_v51, %v1062_v62  ;;  %v1135_v15 = vadd.f32 %v1119_v52, %v1063_v10 }
 0x3b7   : > { %v1092_v12 = vpop.permute.xlu1 %1091  ;;  %v1042_v20 = vmul.f32 %v2570_v50, %v1015_v61  ;;  %v1043_v21 = vmul.f32 %v2573_v14, %v1015_v61 }
 0x3b8   : > { %v1120_v16 = vmul.f32 %v2576_v17, %v1092_v12  ;;  %v1121_v18 = vmul.f32 %v2579_v53, %v1092_v12  ;;  %v1150_v11 = vmax.f32 %v1134_v60, 0.0  ;;  %v1151_v25 = vmax.f32 %v1135_v15, 0.0 }
 0x3b9   : > { %v1066_v46 = vadd.f32 %v2582_v24, %v1042_v20  ;;  %v1067_v31 = vadd.f32 %v2585_v54, %v1043_v21 }
 0x3ba   : > { %v1136_v23 = vadd.f32 %v1120_v16, %v1064_v63  ;;  %v1137_v6 = vadd.f32 %v1121_v18, %v1065_v4 }
 0x3bb   : > { %v1096_v19 = vpop.permute.xlu0 %1095 }
 0x3bc   : > { %v1020_v26 = vpop.permute.xlu1 %1019  ;;  %v1152_v3 = vmax.f32 %v1136_v23, 0.0  ;;  %v1153_v5 = vmax.f32 %v1137_v6, 0.0  ;;  %v1122_v9 = vmul.f32 %v2576_v17, %v1096_v19  ;;  %v1123_v27 = vmul.f32 %v2579_v53, %v1096_v19 }
 0x3bd   : > { %v1044_v43 = vmul.f32 %v2570_v50, %v1020_v26  ;;  %v1045_v28 = vmul.f32 %v2573_v14, %v1020_v26 }
 0x3be   : > { %v1195_v32 = vpack.c.bf16 %v1153_v5, %v1151_v25  ;;  %v1194_v33 = vpack.c.bf16 %v1152_v3, %v1150_v11  ;;  %v1138_v55 = vadd.f32 %v1122_v9, %v1066_v46  ;;  %v1139_v34 = vadd.f32 %v1123_v27, %v1067_v31 }
 0x3bf   : > { %v1068_v58 = vadd.f32 %v2582_v24, %v1044_v43  ;;  %v1069_v36 = vadd.f32 %v2585_v54, %v1045_v28  ;;  %v2137_v24 = vld [vmem:[#allocation4 + $0xf8] sm:$0xff]   ;;  %v2140_v54 = vld [vmem:[#allocation4 + $0xc0] sm:$0xff]  }
 0x3c0   : > { %1421 = vmatprep.mubr.bf16.mxu1 %v1195_v32  ;;  %v1154_v39 = vmax.f32 %v1138_v55, 0.0  ;;  %v1155_v22 = vmax.f32 %v1139_v34, 0.0  ;;  %1926 = vmatprep.subr.bf16.mxu0 %v2137_v24 }
 0x3c1   : > { %v1100_v7 = vpop.permute.xlu1 %1099  ;;  %1422 = vmatmul.mubr.bf16.gmra.mrb[24].mxu1 %v1194_v33  ;;  %1927 = vmatpush3.bf16.msra.mxu0 %v2138_v30 }
 0x3c2   : > { %v1124_v38 = vmul.f32 %v2576_v17, %v1100_v7  ;;  %v1125_v50 = vmul.f32 %v2579_v53, %v1100_v7  ;;  %v2139_v17 = vld [vmem:[#allocation4 + $0x100] sm:$0xff]   ;;  %v1198_v53 = vld [vmem:[#allocation2 + $0x250] sm:$0x11] }
 0x3c3   : > { %1928 = vmatprep.subr.bf16.mxu0 %v2139_v17  ;;  %v1199_v37 = vunpack.c.l.bf16 %v1198_v53  ;;  %v1200_v1 = vunpack.c.h.bf16 %v1198_v53  ;;  %v1498_v17 = vld [vmem:[#allocation4 + $0x108] sm:$0x1] }
 0x3c4   : > { %v1140_v14 = vadd.f32 %v1124_v38, %v1068_v58  ;;  %v1141_v8 = vadd.f32 %v1125_v50, %v1069_v36 }
 0x3c5   : > { %1929 = vmatpush3.bf16.msra.mxu0 %v2140_v54  ;;  %v1204_v40 = vrot.slane %v1199_v37, %v2406_v59  ;;  %v1208_v0 = vrot.slane %v1200_v1, %v2406_v59  ;;  %v1499_v54 = vunpack.c.l.bf16 %v1498_v17 }
 0x3c6   : > { %v1156_v2 = vmax.f32 %v1140_v14, 0.0  ;;  %v1157_v41 = vmax.f32 %v1141_v8, 0.0 }
 0x3c7   : > { %v1503_v37 = vrot.slane %v1499_v54, %v2406_v59 }
 0x3c8   : > { %v1197_v35 = vpack.c.bf16 %v1157_v41, %v1155_v22  ;;  %v1196_v42 = vpack.c.bf16 %v1156_v2, %v1154_v39 }
 0x3ca   : > { %1431 = vmatprep.mubr.bf16.mxu1 %v1197_v35 }
 0x3cb   : > { %1432 = vmatmul.mubr.bf16.gmra.mrb[28].mxu1 %v1196_v42 }
 0x47c   : > { %v1403_v44 = vpop.f32.mrb[16].mxu1 }
 0x47d   : > { %v1404_v45 = vadd.f32 %v1403_v44, %v1204_v40  ;;  %v1405_v47 = vpop.f32.mrb[17].mxu1 }
 0x47e   : > { %v1406_v48 = vadd.f32 %v1405_v47, %v1208_v0  ;;  %v1407_v49 = vpop.f32.mrb[18].mxu1 }
 0x47f   : > { %v1408_v13 = vadd.f32 %v1407_v49, %v1204_v40  ;;  %v1409_v51 = vpop.f32.mrb[19].mxu1  ;;  %v1442_v56 = vmax.f32 %v1404_v45, 0.0 }
 0x480   : > { %v1410_v52 = vadd.f32 %v1409_v51, %v1208_v0  ;;  %v1443_v61 = vmax.f32 %v1406_v48, 0.0 }
 0x481   : > { %v1444_v57 = vmax.f32 %v1408_v13, 0.0 }
 0x482   : > { %v1445_v62 = vmax.f32 %v1410_v52, 0.0 }
 0x483   : > { %v1490_v10 = vpack.c.bf16 %v1444_v57, %v1442_v56 }
 0x484   : > { %v1491_v12 = vpack.c.bf16 %v1445_v62, %v1443_v61 }
 0x486   : > { %v1413_v60 = vpop.f32.mrb[20].mxu1  ;;  %1632 = vmatprep.mubr.bf16.mxu0 %v1491_v12 }
 0x487   : > { %v1414_v15 = vadd.f32 %v1413_v60, %v1204_v40  ;;  %v1415_v63 = vpop.f32.mrb[21].mxu1  ;;  %1633 = vmatmul.mubr.bf16.vlgmr.msra.gmra.mrb[16].mxu0 %v1490_v10 }
 0x488   : > { %v1416_v4 = vadd.f32 %v1415_v63, %v1208_v0  ;;  %v1417_v16 = vpop.f32.mrb[22].mxu1 }
 0x489   : > { %v1418_v18 = vadd.f32 %v1417_v16, %v1204_v40  ;;  %v1419_v19 = vpop.f32.mrb[23].mxu1  ;;  %v1446_v21 = vmax.f32 %v1414_v15, 0.0 }
 0x48a   : > { %v1420_v20 = vadd.f32 %v1419_v19, %v1208_v0  ;;  %v1447_v6 = vmax.f32 %v1416_v4, 0.0 }
 0x48b   : > { %v1448_v23 = vmax.f32 %v1418_v18, 0.0 }
 0x48c   : > { %v1449_v11 = vmax.f32 %v1420_v20, 0.0 }
 0x48d   : > { %v1492_v25 = vpack.c.bf16 %v1448_v23, %v1446_v21 }
 0x48e   : > { %v1493_v26 = vpack.c.bf16 %v1449_v11, %v1447_v6 }
 0x490   : > { %1640 = vmatprep.mubr.bf16.mxu0 %v1493_v26 }
 0x491   : > { %1641 = vmatmul.mubr.bf16.gmra.mrb[20].mxu0 %v1492_v25 }
 0x494   : > { %v1423_v3 = vpop.f32.mrb[24].mxu1 }
 0x495   : > { %v1424_v5 = vadd.f32 %v1423_v3, %v1204_v40  ;;  %v1425_v9 = vpop.f32.mrb[25].mxu1 }
 0x496   : > { %v1426_v27 = vadd.f32 %v1425_v9, %v1208_v0  ;;  %v1427_v43 = vpop.f32.mrb[26].mxu1 }
 0x497   : > { %v1428_v28 = vadd.f32 %v1427_v43, %v1204_v40  ;;  %v1429_v46 = vpop.f32.mrb[27].mxu1  ;;  %v1450_v32 = vmax.f32 %v1424_v5, 0.0 }
 0x498   : > { %v1430_v31 = vadd.f32 %v1429_v46, %v1208_v0  ;;  %v1451_v55 = vmax.f32 %v1426_v27, 0.0 }
 0x499   : > { %v1452_v33 = vmax.f32 %v1428_v28, 0.0 }
 0x49a   : > { %v1453_v34 = vmax.f32 %v1430_v31, 0.0 }
 0x49b   : > { %v1494_v7 = vpack.c.bf16 %v1452_v33, %v1450_v32 }
 0x49c   : > { %v1495_v58 = vpack.c.bf16 %v1453_v34, %v1451_v55 }
 0x49e   : > { %v1433_v36 = vpop.f32.mrb[28].mxu1  ;;  %1648 = vmatprep.mubr.bf16.mxu0 %v1495_v58 }
 0x49f   : > { %v1434_v38 = vadd.f32 %v1433_v36, %v1204_v40  ;;  %v1435_v50 = vpop.f32.mrb[29].mxu1  ;;  %1649 = vmatmul.mubr.bf16.gmra.mrb[24].mxu0 %v1494_v7 }
 0x4a0   : > { %v1436_v14 = vadd.f32 %v1435_v50, %v1208_v0  ;;  %v1437_v8 = vpop.f32.mrb[30].mxu1 }
 0x4a1   : > { %v1438_v39 = vadd.f32 %v1437_v8, %v1204_v40  ;;  %v1439_v22 = vpop.f32.mrb[31].mxu1  ;;  %v1454_v41 = vmax.f32 %v1434_v38, 0.0 }
 0x4a2   : > { %v1440_v2 = vadd.f32 %v1439_v22, %v1208_v0  ;;  %v1455_v42 = vmax.f32 %v1436_v14, 0.0 }
 0x4a3   : > { %v1456_v35 = vmax.f32 %v1438_v39, 0.0 }
 0x4a4   : > { %v1457_v29 = vmax.f32 %v1440_v2, 0.0 }
 0x4a5   : > { %v1496_v24 = vpack.c.bf16 %v1456_v35, %v1454_v41 }
 0x4a6   : > { %v1497_v30 = vpack.c.bf16 %v1457_v29, %v1455_v42 }
 0x4a8   : > { %1656 = vmatprep.mubr.bf16.mxu0 %v1497_v30 }
 0x4a9   : > { %1657 = vmatmul.mubr.bf16.gmra.mrb[28].mxu0 %v1496_v24 }
 0x55a   : > { %v1930_v53 = vpop.f32.mrb[16].mxu0 }
 0x55b   : > { %v1931_v1 = vpop.f32.mrb[17].mxu0 }
 0x55c   : > { %v1932_v40 = vadd.f32 %v1931_v1, %v1930_v53  ;;  %v1933_v44 = vpop.f32.mrb[18].mxu0 }
 0x55d   : > { %v1934_v0 = vpop.f32.mrb[19].mxu0 }
 0x55e   : > { %v1635_v45 = vadd.f32 %v1932_v40, %v1503_v37  ;;  %v1935_v47 = vadd.f32 %v1934_v0, %v1933_v44 }
 0x560   : > { %1673 = vst [vmem:[%s2485_s27 + $0x8] sm:$0xff] %v1635_v45  ;;  %v1638_v48 = vadd.f32 %v1935_v47, %v1503_v37 }
 0x562   : > { %1674 = vst [vmem:[%s2485_s27 + $0x18] sm:$0xff] %v1638_v48 }
 0x564   : > { %v1936_v49 = vpop.f32.mrb[20].mxu0 }
 0x565   : > { %v1937_v13 = vpop.f32.mrb[21].mxu0 }
 0x566   : > { %v1938_v51 = vadd.f32 %v1937_v13, %v1936_v49  ;;  %v1939_v52 = vpop.f32.mrb[22].mxu0 }
 0x567   : > { %v1940_v56 = vpop.f32.mrb[23].mxu0 }
 0x568   : > { %v1643_v57 = vadd.f32 %v1938_v51, %v1503_v37  ;;  %v1941_v59 = vadd.f32 %v1940_v56, %v1939_v52 }
 0x56a   : > { %1675 = vst [vmem:[%s2485_s27 + $0x28] sm:$0xff] %v1643_v57  ;;  %v1646_v61 = vadd.f32 %v1941_v59, %v1503_v37 }
 0x56c   : > { %1676 = vst [vmem:[%s2485_s27 + $0x38] sm:$0xff] %v1646_v61 }
 0x572   : > { %v1942_v62 = vpop.f32.mrb[24].mxu0 }
 0x573   : > { %v1943_v10 = vpop.f32.mrb[25].mxu0 }
 0x574   : > { %v1944_v12 = vadd.f32 %v1943_v10, %v1942_v62  ;;  %v1945_v60 = vpop.f32.mrb[26].mxu0 }
 0x575   : > { %v1946_v15 = vpop.f32.mrb[27].mxu0 }
 0x576   : > { %v1651_v63 = vadd.f32 %v1944_v12, %v1503_v37  ;;  %v1947_v4 = vadd.f32 %v1946_v15, %v1945_v60 }
 0x578   : > { %1677 = vst [vmem:[%s2485_s27 + $0x48] sm:$0xff] %v1651_v63  ;;  %v1654_v16 = vadd.f32 %v1947_v4, %v1503_v37 }
 0x57a   : > { %1678 = vst [vmem:[%s2485_s27 + $0x58] sm:$0xff] %v1654_v16 }
 0x57c   : > { %v1948_v18 = vpop.f32.mrb[28].mxu0 }
 0x57d   : > { %v1949_v19 = vpop.f32.mrb[29].mxu0 }
 0x57e   : > { %v1950_v20 = vadd.f32 %v1949_v19, %v1948_v18  ;;  %v1951_v21 = vpop.f32.mrb[30].mxu0 }
 0x57f   : > { %v1952_v23 = vpop.f32.mrb[31].mxu0 }
 0x580   : > { %v1659_v6 = vadd.f32 %v1950_v20, %v1503_v37  ;;  %v1953_v11 = vadd.f32 %v1952_v23, %v1951_v21 }
 0x582   : > { %1679 = vst [vmem:[%s2485_s27 + $0x68] sm:$0xff] %v1659_v6  ;;  %v1662_v25 = vadd.f32 %v1953_v11, %v1503_v37 }
 0x584   : > { %1680 = vst [vmem:[%s2485_s27 + $0x78] sm:$0xff] %v1662_v25 }
 0x585 PF: > { %s15_s12 = sadd.s32 1, %s2227_s12  }
 0x586   : > { %p12_p2 = scmp.ge.s32.totalorder %s15_s12, 4  }
 0x588   :  { %14 = sbr.rel (!%p12_p2) target bundleno = 2 (0x2), region = 71 }
 0x58f   :  { %1705 = vsyncpa [#allocation3], 1 }
 0x590   :  { %1707 = vsyncpa [#allocation3 + $0x1], 1 }
 0x591   :  { %1708 = vsyncpa [#allocation5], 1 }

</bundles_post_ra>
